<compile_context>
chip_gen: v6e
topology: v6e:2x2x1
jax: 0.10.0
libtpu: 0.0.40
codegen_flags: <defaults>
</compile_context>

<pallas_src>
import functools

import numpy as np
import jax
import jax.numpy as jnp
from jax.experimental import pallas as pl
from jax.experimental.pallas import tpu as pltpu

# pywt db3 analysis filters (deterministic constants, no checkpoint needed).
DB3_DEC_LO = (
    0.035226291882100656,
    -0.08544127388224149,
    -0.13501102001039084,
    0.4598775021193313,
    0.8068915093133388,
    0.3326705529509569,
)
DB3_DEC_HI = (
    -0.3326705529509569,
    0.8068915093133388,
    -0.4598775021193313,
    -0.13501102001039084,
    0.08544127388224149,
    0.035226291882100656,
)
# pytorch_wavelets prep_filt_afb1d flips the dec filters and conv2d cross-correlates,
# so the kernels actually applied to the zero-padded signal are the reversed dec filters.
CC_LO = tuple(reversed(DB3_DEC_LO))
CC_HI = tuple(reversed(DB3_DEC_HI))

_FLEN = 6        # db3 filter length
_PAD_LEFT = 4    # afb1d mode='zero': pad 4 left, 4 (+1 if odd length) right

# Weight dtype for the composed band matrix. float32 keeps full accuracy everywhere;
# on v5e (lowest f32 MXU rate) jnp.bfloat16 halves filter DMA/VMEM and ~4x the MXU rate
# with ~1e-3 relative error for these 6-tap filters.
FILTER_DTYPE = jnp.float32


def _out_len(lin):
    # pywt.dwt_coeff_len(lin, 6, 'zero') == floor((lin + 5) / 2)
    return (lin + _FLEN - 1) // 2


def _band_matrix_np(lin, taps):
    """(lin, lout) banded matrix C with C[i, j] = taps[i - 2j + 4] (zero off-band).

    x @ C == zero-pad(x, 4 | 4+odd), cross-correlate with `taps`, stride 2 — i.e. exactly
    pytorch_wavelets afb1d(mode='zero') for one analysis filter.  Built with numpy in
    float64 so the level-to-level composition below is exact (no trace-time TPU matmuls).
    """
    lout = _out_len(lin)
    i = np.arange(lin)[:, None]
    j = np.arange(lout)[None, :]
    k = i - 2 * j + _PAD_LEFT
    t = np.asarray(taps, dtype=np.float64)
    valid = (k >= 0) & (k < _FLEN)
    return np.where(valid, t[np.clip(k, 0, _FLEN - 1)], 0.0)


@functools.lru_cache(maxsize=None)
def _composed_weight_np(L0):
    """Pre-compose all 3 analysis levels into one (L0, L3+L1+L2+L3) matrix.

    Columns laid out as [Yl | Yh0 | Yh1 | Yh2], matching the module's torch.cat order.
    """
    L1, L2 = _out_len(L0), _out_len(_out_len(L0))
    c1l, c1h = _band_matrix_np(L0, CC_LO), _band_matrix_np(L0, CC_HI)
    c2l, c2h = _band_matrix_np(L1, CC_LO), _band_matrix_np(L1, CC_HI)
    c3l, c3h = _band_matrix_np(L2, CC_LO), _band_matrix_np(L2, CC_HI)
    c12l = c1l @ c2l
    return np.concatenate([c12l @ c3l, c1h, c1l @ c2h, c12l @ c3h], axis=1)


def _dwt3_kernel(x_ref, w_ref, out_ref):
    """Fused 3-level db3 analysis for one row tile: a single lane-dense GEMM.

    x_ref   : (tb, L0)    input rows (signal along lanes) — the only HBM input stream.
    w_ref   : (L0, total) composed 3-level band matrix (constant block, VMEM-resident).
    out_ref : (tb, total) already-concatenated [Yl | Yh0 | Yh1 | Yh2] output block.
    """
    out_ref[...] = jnp.dot(
        x_ref[...], w_ref[...],
        preferred_element_type=jnp.float32,
        precision=jax.lax.Precision.HIGHEST,
    ).astype(out_ref.dtype)


def reshape_tensor(x):
    # TODO(synk): original helper `reshape_tensor` is not provided; assume it flattens
    # NCHW spatial dims to (N, C, H*W) as required by DWT1D.
    N, C, H, W = x.shape
    return x.reshape(N, C, H * W)


def _round_up(v, m):
    return (v + m - 1) // m * m


def _pick_row_tile(B):
    """Row tile: multiple of 8 (sublane rule) or the full row dim.

    For B >= 16 the tile is capped so the grid has >= 2 steps (lets the "parallel" axis
    shard across v7x's two TensorCores) and at 512 rows (~1.1 MiB f32 in+out per step,
    well past the ~85% HBM-roofline plateau, tiny vs. any generation's VMEM).
    """
    if B < 16:
        return max(B, 1)                 # single tile equal to the full rows dim
    half = -(-B // 2)                    # ceil(B/2)
    return min(512, _round_up(half, 8))


@jax.jit
def dwt_layer(x):
    """Forward pass of DWT_Layer.  x: (N, C, H, W) float -> (N, C, L3+L1+L2+L3) f32."""
    x3 = reshape_tensor(x)
    if not jnp.issubdtype(x3.dtype, jnp.floating):
        x3 = x3.astype(jnp.float32)
    N, C, L0 = x3.shape
    B = N * C
    L1 = _out_len(L0)
    L2 = _out_len(L1)
    L3 = _out_len(L2)
    total = L3 + L1 + L2 + L3

    # Composed constant weight (exact, host-built, cached per L0); fetched into VMEM once.
    # TODO(synk): for very long signals (L0 >~ 2.5k on v7x's 32 MiB scoped VMEM) the
    # O(L0 * 1.34*L0) band matrix should be K-tiled (extra "arbitrary" grid axis + f32
    # accumulator) or replaced by a strided-FIR variant.
    w = jnp.asarray(_composed_weight_np(L0), dtype=FILTER_DTYPE)

    x2d = x3.reshape(B, L0)
    tb = _pick_row_tile(B)

    out = pl.pallas_call(
        _dwt3_kernel,
        out_shape=jax.ShapeDtypeStruct((B, total), jnp.float32),
        grid=(pl.cdiv(B, tb),),
        in_specs=[
            pl.BlockSpec((tb, L0), lambda i: (i, 0)),
            pl.BlockSpec((L0, total), lambda i: (0, 0)),
        ],
        out_specs=pl.BlockSpec((tb, total), lambda i: (i, 0)),
        compiler_params=pltpu.CompilerParams(
            dimension_semantics=("parallel",),
            vmem_limit_bytes=32 * 1024 * 1024,
        ),
    )(x2d, w)

    return out.reshape(N, C, total)


# -----------------------------------------------------------------------------
# Pure-JAX reference (direct padded stride-2 cross-correlation, level by level)
# for a numerical sanity check of the kernel.
# -----------------------------------------------------------------------------
def _ref_dwt_level(x2d):
    b, L = x2d.shape
    odd = L % 2
    xp = jnp.pad(x2d, ((0, 0), (4, 4 + odd)))
    lout = _out_len(L)
    lo = jnp.zeros((b, lout), jnp.float32)
    hi = jnp.zeros((b, lout), jnp.float32)
    for k in range(_FLEN):
        seg = xp[:, k:k + 2 * lout:2]
        lo = lo + seg * CC_LO[k]
        hi = hi + seg * CC_HI[k]
    return lo, hi


def _ref_dwt_layer(x):
    x3 = reshape_tensor(x).astype(jnp.float32)
    N, C, L = x3.shape
    cur = x3.reshape(N * C, L)
    highs = []
    for _ in range(3):
        lo, hi = _ref_dwt_level(cur)
        highs.append(hi)
        cur = lo
    return jnp.concatenate([cur] + highs, axis=1).reshape(N, C, -1)


if __name__ == "__main__":
    key = jax.random.PRNGKey(0)
    x = jax.random.normal(key, (2, 4, 16, 16), dtype=jnp.float32)

    out = dwt_layer(x)
    jax.block_until_ready(out)

    # L0=256 -> L1=130 -> L2=67 -> L3=36 ; cat = 36+130+67+36 = 269
    assert out.shape == (2, 4, 269), out.shape
    assert out.dtype == jnp.float32

    ref = _ref_dwt_layer(x)
    rel_err = float(jnp.max(jnp.abs(out - ref) / (jnp.abs(ref) + 1.0)))
    assert rel_err < 1e-4, rel_err
    print("KERNEL_OK")
</pallas_src>

<mosaic_0001>
module attributes {stable_mosaic.version = 11 : i64} {
  func.func @_dwt3_kernel(%arg0: i32, %arg1: memref<8x256xf32, #tpu.memory_space<vmem>>, %arg2: memref<256x269xf32, #tpu.memory_space<vmem>>, %arg3: memref<8x269xf32, #tpu.memory_space<vmem>>) attributes {dimension_semantics = [#tpu.dimension_semantics<parallel>], iteration_bounds = array<i64: 1>, scalar_prefetch = 0 : i64, scratch_operands = 0 : i64, tpu.core_type = #tpu.core_type<tc>, window_params = [{transform_indices = @transform_0, window_bounds = array<i64: 8, 256>}, {pipeline_mode = #tpu.pipeline_mode<synchronous>, transform_indices = @transform_1, window_bounds = array<i64: 256, 269>}, {transform_indices = @transform_2, window_bounds = array<i64: 8, 269>}]} {
    %c0 = arith.constant 0 : index
    %c0_0 = arith.constant 0 : index
    %0 = vector.load %arg1[%c0, %c0_0] : memref<8x256xf32, #tpu.memory_space<vmem>>, vector<8x256xf32>
    %c0_1 = arith.constant 0 : index
    %c0_2 = arith.constant 0 : index
    %1 = vector.load %arg2[%c0_1, %c0_2] : memref<256x269xf32, #tpu.memory_space<vmem>>, vector<256x269xf32>
    %cst = arith.constant dense<0.000000e+00> : vector<8x269xf32>
    %2 = tpu.matmul %0, %1, %cst {dimension_numbers = #tpu.dot_dimension_numbers<[1], [0], [0], [1], [0, 0, 1, 1], [], []>, precision = #tpu.contract_precision<fp32>} : vector<8x256xf32>, vector<256x269xf32>, vector<8x269xf32> -> vector<8x269xf32>
    %c0_3 = arith.constant 0 : index
    %c0_4 = arith.constant 0 : index
    %3 = vector.load %arg3[%c0_3, %c0_4] : memref<8x269xf32, #tpu.memory_space<vmem>>, vector<8x269xf32>
    tpu.vector_store %arg3[%c0_3, %c0_4], %2 {strides = array<i32>} : memref<8x269xf32, #tpu.memory_space<vmem>>, vector<8x269xf32>,
    return
  }
  func.func @transform_0(%arg0: i32) -> (i32, i32) {
    %c0_i32 = arith.constant 0 : i32
    %c0_i32_0 = arith.constant 0 : i32
    return %arg0, %c0_i32 : i32, i32
  }
  func.func @transform_1(%arg0: i32) -> (i32, i32) {
    %c0_i32 = arith.constant 0 : i32
    %c0_i32_0 = arith.constant 0 : i32
    %c0_i32_1 = arith.constant 0 : i32
    return %c0_i32, %c0_i32_0 : i32, i32
  }
  func.func @transform_2(%arg0: i32) -> (i32, i32) {
    %c0_i32 = arith.constant 0 : i32
    %c0_i32_0 = arith.constant 0 : i32
    return %arg0, %c0_i32 : i32, i32
  }
}

</mosaic_0001>

<bundles_post_ra>
// kernel: dwt_layer.1
= control target key start
LH: loop header
LB: loop body
LE: loop exit
PB: predicated region body
PF: predicated region fallthrough
CT: control target
= control target key end

     0   :  { %7 = vsyncpa [#allocation3], 0  ;;  %s2513_s9 = smov [#allocation2]   ;;  %s4302_s0 = inlined_call_operand.vmem [shape: f32[8,256], index: 0, kind: input, shape index: {}]   ;;  %s4303_s1 = inlined_call_operand.hbm [shape: f32[256,269], index: 1, kind: input, shape index: {}]   ;;  %s4304_s2 = inlined_call_operand.vmem [shape: f32[8,269], index: 2, kind: output, shape index: {}]  }
   0x1   :  { %s15_s10 = sshll.u32 %s2513_s9, 4  ;;  %s16_s10 = int_to_ptr.vmem [resolvable:$true] %s15_s10 }
   0x2   :  { %s2499_s11 = scalar_lea.vmem %s16_s10, 12288  ;;  %p2504_p1 = scmp.lt.s32.totalorder %s16_s10, %s16_s10 }
   0x3   :  { %p2500_p0 = scmp.ne.s32.totalorder %s16_s10, %s2499_s11  ;;  %p2505_p2 = scmp.lt.s32.totalorder %s2499_s11, %s2499_s11 }
   0x5   :  { %p2506_p3 = por %p2505_p2, %p2504_p1 }
   0x7   :  { %p2507_p4 = pnand %p2506_p3, %p2500_p0 }
   0x9   :  { %2510 = shalt.err (!%p2507_p4)
}
   0xa   :  { %s2514_s12 = smov 384   ;;  %s2515_s13 = smov 24  }
   0xb   :  { %21 = dma.hbm_to_vmem [thread:$0]  %s4303_s1, 12288, %s16_s10, [#allocation3], %s2514_s12, %s2514_s12, %s2515_s13  }
   0xc   :  { %2511 = dma.done.wait [#allocation3], 12288  }
   0xd   :  { %2512 = vsyncadd [#allocation3], 4294955008  ;;  %v73_v0 = vld [vmem:[#allocation2 + $0x170] sm:$0xff]  ;;  %v72_v1 = vld [vmem:[#allocation2 + $0x168] sm:$0xff]  ;;  %vm2271_vm0 = vcmask 105472  }
   0xe   :  { %v70_v2 = vld [vmem:[#allocation2 + $0x158] sm:$0xff]  ;;  %v2534_v3 = vand.u32 4294901760, %v73_v0  ;;  %v2536_v4 = vand.u32 4294901760, %v72_v1  ;;  %v69_v6 = vld [vmem:[#allocation2 + $0x150] sm:$0xff]  ;;  %v67_v7 = vld [vmem:[#allocation2 + $0x140] sm:$0xff] }
   0xf   :  { %v2538_v5 = vand.u32 4294901760, %v70_v2  ;;  %v66_v8 = vld [vmem:[#allocation2 + $0x138] sm:$0xff]  ;;  %v2540_v9 = vand.u32 4294901760, %v69_v6  ;;  %v2542_v10 = vand.u32 4294901760, %v67_v7  ;;  %v64_v12 = vld [vmem:[#allocation2 + $0x128] sm:$0xff]  ;;  %v63_v13 = vld [vmem:[#allocation2 + $0x120] sm:$0xff] }
  0x10   :  { %v2544_v11 = vand.u32 4294901760, %v66_v8  ;;  %v61_v14 = vld [vmem:[#allocation2 + $0x110] sm:$0xff]  ;;  %124 = vmatprep.subr.mxu0 %v2534_v3  ;;  %v2547_v15 = vand.u32 4294901760, %v64_v12  ;;  %v2549_v16 = vand.u32 4294901760, %v63_v13  ;;  %v2554_v18 = vsub.f32 %v73_v0, %v2534_v3  ;;  %v2556_v19 = vld [vmem:[#allocation2 + $0x108] sm:$0xff]  ;;  %v2558_v20 = vld [vmem:[#allocation2 + $0xf8] sm:$0xff] }
  0x11   :  { %v2551_v17 = vand.u32 4294901760, %v61_v14  ;;  %v2560_v21 = vld [vmem:[#allocation2 + $0xf0] sm:$0xff]  ;;  %126 = vmatpush1.msra.mxu0 %v2536_v4  ;;  %v2564_v22 = vand.u32 4294901760, %v2556_v19  ;;  %v2567_v23 = vsub.f32 %v72_v1, %v2536_v4  ;;  %v2570_v24 = vand.u32 4294901760, %v2558_v20  ;;  %v2575_v26 = vld [vmem:[#allocation2 + $0xe0] sm:$0xff]  ;;  %v2577_v27 = vld [vmem:[#allocation2 + $0xd8] sm:$0xff] }
  0x12   :  { %v2573_v25 = vsub.f32 %v70_v2, %v2538_v5  ;;  %v2579_v28 = vld [vmem:[#allocation2 + $0xc8] sm:$0xff]  ;;  %128 = vmatprep.subr.mxu0 %v2538_v5  ;;  %v4318_v29 = vand.u32 4294901760, %v2554_v18  ;;  %v2584_v30 = vand.u32 4294901760, %v2560_v21  ;;  %v2587_v31 = vsub.f32 %v69_v6, %v2540_v9  ;;  %v2601_v37 = vld [vmem:[#allocation2 + $0xc0] sm:$0xff]  ;;  %v2625_v46 = vld [vmem:[#allocation2 + $0xb0] sm:$0xff] }
  0x13   :  { %4580 = vst [vmem:[#allocation5_spill] sm:$0xff] %v2570_v24  ;;  %v2590_v32 = vand.u32 4294901760, %v2575_v26  ;;  %130 = vmatpush1.msra.mxu0 %v2540_v9  ;;  %v4316_v33 = vand.u32 4294901760, %v2567_v23  ;;  %v2596_v35 = vsub.f32 %v67_v7, %v2542_v10  ;;  %v2599_v36 = vand.u32 4294901760, %v2577_v27  ;;  %v2635_v51 = vld [vmem:[#allocation2 + $0xa8] sm:$0xff]  ;;  %v2642_v56 = vld [vmem:[#allocation2 + $0x98] sm:$0xff] }
  0x14   :  { %4581 = vst [vmem:[#allocation6_spill] sm:$0xff] %v2584_v30  ;;  %v4315_v34 = vand.u32 4294901760, %v2573_v25  ;;  %132 = vmatprep.subr.mxu0 %v2542_v10  ;;  %v271_v38 = vsub.f32 %v2554_v18, %v4318_v29  ;;  %v4313_v39 = vand.u32 4294901760, %v2587_v31  ;;  %v2609_v40 = vsub.f32 %v66_v8, %v2544_v11  ;;  %v2654_v61 = vld [vmem:[#allocation2 + $0x90] sm:$0xff]  ;;  %v2666_v2 = vld [vmem:[#allocation2 + $0x80] sm:$0xff] }
  0x15   :  { %4582 = vst [vmem:[#allocation7_spill] sm:$0xff] %v2590_v32  ;;  %4583 = vst [vmem:[#allocation8_spill] sm:$0xff] %v2599_v36  ;;  %v2612_v41 = vand.u32 4294901760, %v2579_v28  ;;  %134 = vmatpush1.msra.mxu0 %v2544_v11  ;;  %v277_v42 = vsub.f32 %v2567_v23, %v4316_v33  ;;  %v4311_v44 = vand.u32 4294901760, %v2596_v35  ;;  %v2623_v45 = vsub.f32 %v64_v12, %v2547_v15 }
  0x16   :  { %v283_v43 = vsub.f32 %v2573_v25, %v4315_v34  ;;  %136 = vmatprep.subr.mxu0 %v2547_v15  ;;  %v272_v47 = vand.u32 4294901760, %v271_v38  ;;  %v289_v48 = vsub.f32 %v2587_v31, %v4313_v39  ;;  %v4310_v49 = vand.u32 4294901760, %v2609_v40  ;;  %v2757_v39 = vld [vmem:[#allocation2 + $0x38] sm:$0xff]  ;;  %v2767_v34 = vld [vmem:[#allocation2 + $0x30] sm:$0xff] }
  0x17   :  { %4584 = vst [vmem:[#allocation9_spill] sm:$0xff] %v2612_v41  ;;  %v2633_v50 = vand.u32 4294901760, %v2601_v37  ;;  %138 = vmatpush1.msra.mxu0 %v2549_v16  ;;  %v278_v52 = vand.u32 4294901760, %v277_v42  ;;  %v295_v54 = vsub.f32 %v2596_v35, %v4311_v44  ;;  %v4308_v55 = vand.u32 4294901760, %v2623_v45 }
  0x18   :  { %v284_v53 = vand.u32 4294901760, %v283_v43  ;;  %140 = vmatprep.subr.mxu0 %v2551_v17  ;;  %273 = vmatprep.subr.mxu1 %v272_v47  ;;  %v290_v57 = vand.u32 4294901760, %v289_v48  ;;  %v301_v58 = vsub.f32 %v2609_v40, %v4310_v49  ;;  %v2649_v59 = vsub.f32 %v63_v13, %v2549_v16  ;;  %v2677_v13 = vld [vmem:[#allocation2 + $0x78] sm:$0xff]  ;;  %v2744_v49 = vld [vmem:[#allocation2 + $0x48] sm:$0xff] }
  0x19   :  { %4585 = vst [vmem:[#allocation10_spill] sm:$0xff] %v2633_v50  ;;  %v2652_v60 = vand.u32 4294901760, %v2625_v46  ;;  %142 = vmatpush1.msra.mxu0 %v2564_v22  ;;  %279 = vmatpush1.msra.mxu1 %v278_v52  ;;  %v296_v62 = vand.u32 4294901760, %v295_v54  ;;  %v307_v63 = vsub.f32 %v2623_v45, %v4308_v55  ;;  %v2661_v0 = vsub.f32 %v61_v14, %v2551_v17 }
  0x1a   :  { %v2664_v1 = vand.u32 4294901760, %v2635_v51  ;;  %144 = vmatprep.subr.mxu0 %v2570_v24  ;;  %285 = vmatprep.subr.mxu1 %v284_v53  ;;  %v302_v6 = vand.u32 4294901760, %v301_v58  ;;  %v4306_v7 = vand.u32 4294901760, %v2649_v59  ;;  %v2672_v8 = vsub.f32 %v2556_v19, %v2564_v22 }
  0x1b   :  { %4586 = vst [vmem:[#allocation11_spill] sm:$0xff] %v2652_v60  ;;  %v2675_v12 = vand.u32 4294901760, %v2642_v56  ;;  %146 = vmatpush1.msra.mxu0 %v2584_v30  ;;  %291 = vmatpush1.msra.mxu1 %v290_v57  ;;  %v308_v14 = vand.u32 4294901760, %v307_v63  ;;  %v4305_v38 = vand.u32 4294901760, %v2661_v0  ;;  %v2683_v42 = vsub.f32 %v2558_v20, %v2570_v24  ;;  %v2700_v20 = vld [vmem:[#allocation2 + $0x68] sm:$0xff] }
  0x1c   :  { %4587 = vst [vmem:[#allocation12_spill] sm:$0xff] %v2664_v1  ;;  %v2686_v43 = vand.u32 4294901760, %v2654_v61  ;;  %148 = vmatprep.subr.mxu0 %v2590_v32  ;;  %297 = vmatprep.subr.mxu1 %v296_v62  ;;  %v313_v19 = vsub.f32 %v2649_v59, %v4306_v7  ;;  %v4307_v47 = vand.u32 4294901760, %v2672_v8  ;;  %v2695_v48 = vsub.f32 %v2560_v21, %v2584_v30 }
  0x1d   :  { %4588 = vst [vmem:[#allocation13_spill] sm:$0xff] %v2675_v12  ;;  %v2698_v52 = vand.u32 4294901760, %v2666_v2  ;;  %150 = vmatpush1.msra.mxu0 %v2599_v36  ;;  %303 = vmatpush1.msra.mxu1 %v302_v6  ;;  %v319_v53 = vsub.f32 %v2661_v0, %v4305_v38  ;;  %v4309_v54 = vand.u32 4294901760, %v2683_v42  ;;  %v2709_v57 = vsub.f32 %v2575_v26, %v2590_v32  ;;  %v2723_v38 = vld [vmem:[#allocation2 + $0x60] sm:$0xff] }
  0x1e   :  { %4589 = vst [vmem:[#allocation14_spill] sm:$0xff] %v2686_v43  ;;  %v2712_v21 = vand.u32 4294901760, %v2677_v13  ;;  %152 = vmatprep.subr.mxu0 %v2612_v41  ;;  %309 = vmatprep.subr.mxu1 %v308_v14  ;;  %v314_v58 = vand.u32 4294901760, %v313_v19  ;;  %v325_v62 = vsub.f32 %v2672_v8, %v4307_v47  ;;  %v4312_v63 = vand.u32 4294901760, %v2695_v48  ;;  %v2733_v47 = vld [vmem:[#allocation2 + $0x50] sm:$0xff] }
  0x1f   :  { %4590 = vst [vmem:[#allocation15_spill] sm:$0xff] %v2698_v52  ;;  %v2721_v6 = vsub.f32 %v2577_v27, %v2599_v36  ;;  %154 = vmatpush1.msra.mxu0 %v2633_v50  ;;  %v320_v26 = vand.u32 4294901760, %v319_v53  ;;  %v331_v14 = vsub.f32 %v2683_v42, %v4309_v54  ;;  %v4314_v19 = vand.u32 4294901760, %v2709_v57  ;;  %v2847_v36 = vld [vmem:[#allocation2 + $0x2f0] sm:$0xff] }
  0x20   :  { %4591 = vst [vmem:[#allocation16_spill] sm:$0xff] %v2712_v21  ;;  %v2731_v7 = vand.u32 4294901760, %v2700_v20  ;;  %315 = vmatpush1.msra.mxu1 %v314_v58  ;;  %156 = vmatprep.subr.mxu0 %v2652_v60  ;;  %v326_v27 = vand.u32 4294901760, %v325_v62  ;;  %v337_v55 = vsub.f32 %v2695_v48, %v4312_v63  ;;  %v2742_v54 = vsub.f32 %v2579_v28, %v2612_v41 }
  0x21   :  { %v4317_v53 = vand.u32 4294901760, %v2721_v6  ;;  %321 = vmatprep.subr.mxu1 %v320_v26  ;;  %158 = vmatpush1.msra.mxu0 %v2664_v1  ;;  %v332_v44 = vand.u32 4294901760, %v331_v14  ;;  %v343_v58 = vsub.f32 %v2709_v57, %v4314_v19  ;;  %v2751_v62 = vand.u32 4294901760, %v2723_v38 }
  0x22   :  { %4592 = vst [vmem:[#allocation17_spill] sm:$0xff] %v2731_v7  ;;  %v2755_v63 = vsub.f32 %v2601_v37, %v2633_v50  ;;  %327 = vmatpush1.msra.mxu1 %v326_v27  ;;  %160 = vmatprep.subr.mxu0 %v2675_v12  ;;  %v338_v28 = vand.u32 4294901760, %v337_v55  ;;  %v4321_v14 = vand.u32 4294901760, %v2742_v54  ;;  %v2765_v19 = vand.u32 4294901760, %v2733_v47 }
  0x23   :  { %4593 = vst [vmem:[#allocation18_spill] sm:$0xff] %v2751_v62  ;;  %v349_v26 = vsub.f32 %v2721_v6, %v4317_v53  ;;  %333 = vmatprep.subr.mxu1 %v332_v44  ;;  %162 = vmatpush1.msra.mxu0 %v2686_v43  ;;  %v344_v37 = vand.u32 4294901760, %v343_v58  ;;  %v2773_v55 = vsub.f32 %v2625_v46, %v2652_v60  ;;  %v2776_v33 = vand.u32 4294901760, %v2744_v49  ;;  %v2778_v53 = vld [vmem:[#allocation2 + $0x20] sm:$0xff] }
  0x24   :  { %4594 = vst [vmem:[#allocation19_spill] sm:$0xff] %v2765_v19  ;;  %v4324_v27 = vand.u32 4294901760, %v2755_v63  ;;  %339 = vmatpush1.msra.mxu1 %v338_v28  ;;  %164 = vmatprep.subr.mxu0 %v2698_v52  ;;  %v355_v44 = vsub.f32 %v2742_v54, %v4321_v14  ;;  %v2786_v58 = vsub.f32 %v2635_v51, %v2664_v1  ;;  %v2789_v46 = vand.u32 4294901760, %v2757_v39  ;;  %v2803_v51 = vld [vmem:[#allocation2 + $0x18] sm:$0xff] }
  0x25   :  { %4595 = vst [vmem:[#allocation20_spill] sm:$0xff] %v2776_v33  ;;  %v350_v29 = vand.u32 4294901760, %v349_v26  ;;  %345 = vmatprep.subr.mxu1 %v344_v37  ;;  %166 = vmatpush1.msra.mxu0 %v2712_v21  ;;  %v2798_v60 = vsub.f32 %v2642_v56, %v2675_v12  ;;  %v2801_v14 = vand.u32 4294901760, %v2767_v34  ;;  %v2812_v26 = vand.u32 4294901760, %v2778_v53  ;;  %v2814_v56 = vld [vmem:[#allocation2 + $0x8] sm:$0xff] }
  0x26   :  { %4596 = vst [vmem:[#allocation21_spill] sm:$0xff] %v2789_v46  ;;  %v361_v28 = vsub.f32 %v2755_v63, %v4324_v27  ;;  %168 = vmatprep.subr.mxu0 %v2731_v7  ;;  %v356_v37 = vand.u32 4294901760, %v355_v44  ;;  %v2809_v27 = vsub.f32 %v2654_v61, %v2686_v43  ;;  %v4600_v50 = vand.u32 4294901760, %v2773_v55  ;;  %v2837_v44 = vld [vmem:[#allocation2] sm:$0xff] }
  0x27   :  { %4597 = vst [vmem:[#allocation22_spill] sm:$0xff] %v2801_v14  ;;  %351 = vmatpush1.msra.mxu1 %v350_v29  ;;  %4599 = vst [vmem:[#allocation24_spill] sm:$0xff] %v2812_v26  ;;  %170 = vmatpush1.msra.mxu0 %v2751_v62  ;;  %v2823_v1 = vsub.f32 %v2666_v2, %v2698_v52  ;;  %v4602_v61 = vand.u32 4294901760, %v2786_v58  ;;  %v2845_v41 = vand.u32 4294901760, %v2814_v56  ;;  %v2865_v24 = vand.u32 4294901760, %v2837_v44 }
  0x28   :  { %4598 = vst [vmem:[#allocation23_spill] sm:$0xff] %v2809_v27  ;;  %v362_v12 = vand.u32 4294901760, %v361_v28  ;;  %v367_v29 = vsub.f32 %v2773_v55, %v4600_v50  ;;  %357 = vmatprep.subr.mxu1 %v356_v37  ;;  %172 = vmatprep.subr.mxu0 %v2765_v19  ;;  %v2831_v28 = vand.u32 4294901760, %v2803_v51  ;;  %v2835_v50 = vsub.f32 %v2677_v13, %v2712_v21 }
  0x29   :  { %4601 = vst [vmem:[#allocation25_spill] sm:$0xff] %v2823_v1  ;;  %v373_v43 = vsub.f32 %v2786_v58, %v4602_v61  ;;  %174 = vmatpush1.msra.mxu0 %v2776_v33  ;;  %v4605_v37 = vand.u32 4294901760, %v2798_v60  ;;  %4606 = vst [vmem:[#allocation28_spill] sm:$0xff] %v2845_v41  ;;  %v4607_v13 = vand.u32 4294901760, %v2809_v27  ;;  %v2856_v21 = vsub.f32 %v2700_v20, %v2731_v7 }
  0x2a   :  { %4603 = vst [vmem:[#allocation26_spill] sm:$0xff] %v2831_v28  ;;  %4604 = vst [vmem:[#allocation27_spill] sm:$0xff] %v2835_v50  ;;  %363 = vmatpush1.msra.mxu1 %v362_v12  ;;  %v368_v2 = vand.u32 4294901760, %v367_v29  ;;  %176 = vmatprep.subr.mxu0 %v2789_v46  ;;  %v2871_v29 = vld [vmem:[#allocation2 + $0x2d8] sm:$0xff] }
  0x2b   :  { %v379_v52 = vsub.f32 %v2798_v60, %v4605_v37  ;;  %v374_v32 = vand.u32 4294901760, %v373_v43  ;;  %v385_v12 = vsub.f32 %v2809_v27, %v4607_v13  ;;  %4608 = vst [vmem:[#allocation29_spill] sm:$0xff] %v2856_v21  ;;  %v2858_v37 = vld [vmem:[#allocation2 + $0x2e8] sm:$0xff]  ;;  %178 = vmatpush1.msra.mxu0 %v2801_v14  ;;  %v4609_v43 = vand.u32 4294901760, %v2823_v1  ;;  %4610 = vst [vmem:[#allocation30_spill] sm:$0xff] %v2865_v24 }
  0x2c   :  { %369 = vmatprep.subr.mxu1 %v368_v2  ;;  %v2869_v13 = vsub.f32 %v2723_v38, %v2751_v62  ;;  %180 = vmatprep.subr.mxu0 %v2812_v26  ;;  %v2890_v62 = vand.u32 4294901760, %v2858_v37 }
  0x2d   :  { %v380_v61 = vand.u32 4294901760, %v379_v52  ;;  %v391_v30 = vsub.f32 %v2823_v1, %v4609_v43  ;;  %375 = vmatpush1.msra.mxu1 %v374_v32  ;;  %v386_v20 = vand.u32 4294901760, %v385_v12  ;;  %v4612_v52 = vand.u32 4294901760, %v2835_v50  ;;  %v2881_v1 = vld [vmem:[#allocation2 + $0x2d0] sm:$0xff]  ;;  %182 = vmatpush1.msra.mxu0 %v2831_v28 }
  0x2e   :  { %4611 = vst [vmem:[#allocation31_spill] sm:$0xff] %v2869_v13  ;;  %v2879_v43 = vand.u32 4294901760, %v2847_v36  ;;  %v2887_v12 = vsub.f32 %v2733_v47, %v2765_v19  ;;  %4615 = vst [vmem:[#allocation34_spill] sm:$0xff] %v2890_v62  ;;  %184 = vmatprep.subr.mxu0 %v2845_v41  ;;  %v2900_v32 = vsub.f32 %v2744_v49, %v2776_v33  ;;  %v2903_v47 = vand.u32 4294901760, %v2871_v29  ;;  %v2917_v49 = vld [vmem:[#allocation2 + $0x2b8] sm:$0xff] }
  0x2f   :  { %v397_v2 = vsub.f32 %v2835_v50, %v4612_v52  ;;  %381 = vmatprep.subr.mxu1 %v380_v61  ;;  %v392_v38 = vand.u32 4294901760, %v391_v30  ;;  %v2892_v52 = vld [vmem:[#allocation2 + $0x2c0] sm:$0xff]  ;;  %v4616_v61 = vand.u32 4294901760, %v2856_v21  ;;  %186 = vmatpush1.msra.mxu0 %v2865_v24  ;;  %v4619_v19 = vand.u32 4294901760, %v2869_v13 }
  0x30   :  { %4613 = vst [vmem:[#allocation32_spill] sm:$0xff] %v2879_v43  ;;  %4614 = vst [vmem:[#allocation33_spill] sm:$0xff] %v2887_v12  ;;  %387 = vmatpush1.msra.mxu1 %v386_v20  ;;  %v2912_v50 = vsub.f32 %v2757_v39, %v2789_v46  ;;  %188 = vmatprep.subr.mxu0 %v2879_v43  ;;  %v2928_v39 = vld [vmem:[#allocation2 + $0x2a8] sm:$0xff] }
  0x31   :  { %v398_v7 = vand.u32 4294901760, %v397_v2  ;;  %v403_v30 = vsub.f32 %v2856_v21, %v4616_v61  ;;  %4617 = vst [vmem:[#allocation35_spill] sm:$0xff] %v2900_v32  ;;  %4618 = vst [vmem:[#allocation36_spill] sm:$0xff] %v2903_v47  ;;  %393 = vmatprep.subr.mxu1 %v392_v38  ;;  %v409_v20 = vsub.f32 %v2869_v13, %v4619_v19  ;;  %v2915_v61 = vand.u32 4294901760, %v2881_v1 }
  0x32   :  { %4620 = vst [vmem:[#allocation37_spill] sm:$0xff] %v2912_v50  ;;  %v4367_v38 = vand.u32 4294901760, %v2900_v32  ;;  %v2923_v19 = vsub.f32 %v2767_v34, %v2801_v14  ;;  %v2926_v2 = vand.u32 4294901760, %v2892_v52  ;;  %v4624_v13 = vand.u32 4294901760, %v2887_v12  ;;  %190 = vmatpush2.msra.mxu0 %v2890_v62 }
  0x33   :  { %4621 = vst [vmem:[#allocation38_spill] sm:$0xff] %v2915_v61  ;;  %399 = vmatpush1.msra.mxu1 %v398_v7  ;;  %v404_v33 = vand.u32 4294901760, %v403_v30  ;;  %v410_v46 = vand.u32 4294901760, %v409_v20  ;;  %v2937_v30 = vsub.f32 %v2778_v53, %v2812_v26  ;;  %192 = vmatprep.subr.mxu0 %v2903_v47  ;;  %v2945_v14 = vand.u32 4294901760, %v2917_v49  ;;  %v2951_v7 = vld [vmem:[#allocation2 + $0x2a0] sm:$0xff] }
  0x34   :  { %4622 = vst [vmem:[#allocation39_spill] sm:$0xff] %v2923_v19  ;;  %4623 = vst [vmem:[#allocation40_spill] sm:$0xff] %v2926_v2  ;;  %v415_v21 = vsub.f32 %v2887_v12, %v4624_v13  ;;  %v421_v34 = vsub.f32 %v2900_v32, %v4367_v38  ;;  %v2949_v13 = vsub.f32 %v2803_v51, %v2831_v28  ;;  %194 = vmatpush2.msra.mxu0 %v2915_v61  ;;  %v2961_v32 = vld [vmem:[#allocation2 + $0x290] sm:$0xff] }
  0x35   :  { %4625 = vst [vmem:[#allocation41_spill] sm:$0xff] %v2937_v30  ;;  %405 = vmatprep.subr.mxu1 %v404_v33  ;;  %4626 = vst [vmem:[#allocation42_spill] sm:$0xff] %v2945_v14  ;;  %v4628_v33 = vand.u32 4294901760, %v2912_v50  ;;  %v2959_v20 = vand.u32 4294901760, %v2928_v39  ;;  %v4630_v51 = vand.u32 4294901760, %v2923_v19  ;;  %196 = vmatprep.subr.mxu0 %v2926_v2 }
  0x36   :  { %4627 = vst [vmem:[#allocation43_spill] sm:$0xff] %v2949_v13  ;;  %411 = vmatpush1.msra.mxu1 %v410_v46  ;;  %v416_v53 = vand.u32 4294901760, %v415_v21  ;;  %v422_v12 = vand.u32 4294901760, %v421_v34  ;;  %v2970_v46 = vsub.f32 %v2814_v56, %v2845_v41  ;;  %198 = vmatpush2.msra.mxu0 %v2945_v14  ;;  %v2983_v21 = vsub.f32 %v2837_v44, %v2865_v24  ;;  %v3006_v24 = vld [vmem:[#allocation2 + $0x260] sm:$0xff] }
  0x37   :  { %v427_v26 = vsub.f32 %v2912_v50, %v4628_v33  ;;  %4629 = vst [vmem:[#allocation44_spill] sm:$0xff] %v2959_v20  ;;  %v433_v28 = vsub.f32 %v2923_v19, %v4630_v51  ;;  %v2972_v33 = vld [vmem:[#allocation2 + $0x288] sm:$0xff]  ;;  %v4632_v50 = vand.u32 4294901760, %v2937_v30  ;;  %v2979_v51 = vand.u32 4294901760, %v2951_v7  ;;  %v2985_v19 = vld [vmem:[#allocation2 + $0x278] sm:$0xff]  ;;  %200 = vmatprep.subr.mxu0 %v2959_v20 }
  0x38   :  { %4631 = vst [vmem:[#allocation45_spill] sm:$0xff] %v2970_v46  ;;  %417 = vmatprep.subr.mxu1 %v416_v53  ;;  %4634 = vst [vmem:[#allocation47_spill] sm:$0xff] %v2983_v21  ;;  %v4635_v53 = vand.u32 4294901760, %v2949_v13  ;;  %v2993_v41 = vand.u32 4294901760, %v2961_v32 }
  0x39   :  { %v428_v38 = vand.u32 4294901760, %v427_v26  ;;  %v439_v34 = vsub.f32 %v2937_v30, %v4632_v50  ;;  %4633 = vst [vmem:[#allocation46_spill] sm:$0xff] %v2979_v51  ;;  %423 = vmatpush1.msra.mxu1 %v422_v12  ;;  %v434_v56 = vand.u32 4294901760, %v433_v28  ;;  %v2995_v30 = vld [vmem:[#allocation2 + $0x270] sm:$0xff]  ;;  %202 = vmatpush2.msra.mxu0 %v2979_v51  ;;  %v4390_v12 = vand.u32 4294901760, %v2983_v21 }
  0x3a   :  { %v445_v26 = vsub.f32 %v2949_v13, %v4635_v53  ;;  %4636 = vst [vmem:[#allocation48_spill] sm:$0xff] %v2993_v41  ;;  %v3001_v28 = vsub.f32 %v2847_v36, %v2879_v43  ;;  %v3004_v53 = vand.u32 4294901760, %v2972_v33  ;;  %v4639_v13 = vand.u32 4294901760, %v2970_v46  ;;  %204 = vmatprep.subr.mxu0 %v2993_v41 }
  0x3b   :  { %429 = vmatprep.subr.mxu1 %v428_v38  ;;  %v440_v44 = vand.u32 4294901760, %v439_v34  ;;  %v3014_v34 = vsub.f32 %v2858_v37, %v2890_v62  ;;  %v3017_v36 = vand.u32 4294901760, %v2985_v19  ;;  %v457_v43 = vsub.f32 %v2983_v21, %v4390_v12  ;;  %v3031_v37 = vld [vmem:[#allocation2 + $0x258] sm:$0xff] }
  0x3c   :  { %4637 = vst [vmem:[#allocation49_spill] sm:$0xff] %v3001_v28  ;;  %4638 = vst [vmem:[#allocation50_spill] sm:$0xff] %v3004_v53  ;;  %435 = vmatpush1.msra.mxu1 %v434_v56  ;;  %v446_v50 = vand.u32 4294901760, %v445_v26  ;;  %v451_v38 = vsub.f32 %v2970_v46, %v4639_v13  ;;  %206 = vmatpush2.msra.mxu0 %v3004_v53  ;;  %v3026_v13 = vsub.f32 %v2871_v29, %v2903_v47  ;;  %v3042_v29 = vld [vmem:[#allocation2 + $0x248] sm:$0xff] }
  0x3d   :  { %4640 = vst [vmem:[#allocation51_spill] sm:$0xff] %v3014_v34  ;;  %4641 = vst [vmem:[#allocation52_spill] sm:$0xff] %v3017_v36  ;;  %441 = vmatprep.subr.mxu1 %v440_v44  ;;  %v3029_v26 = vand.u32 4294901760, %v2995_v30  ;;  %v4401_v44 = vand.u32 4294901760, %v3014_v34  ;;  %208 = vmatprep.subr.mxu0 %v3017_v36  ;;  %v3037_v12 = vsub.f32 %v2881_v1, %v2915_v61  ;;  %v3040_v56 = vand.u32 4294901760, %v3006_v24 }
  0x3e   :  { %4642 = vst [vmem:[#allocation53_spill] sm:$0xff] %v3026_v13  ;;  %447 = vmatpush1.msra.mxu1 %v446_v50  ;;  %v452_v62 = vand.u32 4294901760, %v451_v38  ;;  %v458_v47 = vand.u32 4294901760, %v457_v43  ;;  %v4646_v21 = vand.u32 4294901760, %v3001_v28  ;;  %v3051_v38 = vsub.f32 %v2892_v52, %v2926_v2  ;;  %v3065_v50 = vld [vmem:[#allocation2 + $0x240] sm:$0xff] }
  0x3f   :  { %4643 = vst [vmem:[#allocation54_spill] sm:$0xff] %v3029_v26  ;;  %4644 = vst [vmem:[#allocation55_spill] sm:$0xff] %v3037_v12  ;;  %210 = vmatpush2.msra.mxu0 %v3029_v26  ;;  %v469_v1 = vsub.f32 %v3014_v34, %v4401_v44  ;;  %v3059_v43 = vand.u32 4294901760, %v3031_v37  ;;  %v3072_v61 = vand.u32 4294901760, %v3042_v29  ;;  %v3074_v34 = vld [vmem:[#allocation2 + $0x230] sm:$0xff]  ;;  %v4652_v27 = vand.u32 4294901760, %v3037_v12 }
  0x40   :  { %4645 = vst [vmem:[#allocation56_spill] sm:$0xff] %v3040_v56  ;;  %v463_v46 = vsub.f32 %v3001_v28, %v4646_v21  ;;  %4647 = vst [vmem:[#allocation57_spill] sm:$0xff] %v3051_v38  ;;  %453 = vmatprep.subr.mxu1 %v452_v62  ;;  %212 = vmatprep.subr.mxu0 %v3040_v56  ;;  %v3063_v21 = vsub.f32 %v2917_v49, %v2945_v14  ;;  %v4650_v62 = vand.u32 4294901760, %v3026_v13 }
  0x41   :  { %4648 = vst [vmem:[#allocation58_spill] sm:$0xff] %v3059_v43  ;;  %459 = vmatpush1.msra.mxu1 %v458_v47  ;;  %4651 = vst [vmem:[#allocation60_spill] sm:$0xff] %v3072_v61  ;;  %v470_v28 = vand.u32 4294901760, %v469_v1  ;;  %v481_v49 = vsub.f32 %v3037_v12, %v4652_v27  ;;  %214 = vmatpush2.msra.mxu0 %v3059_v43  ;;  %v4654_v14 = vand.u32 4294901760, %v3051_v38  ;;  %v3092_v27 = vand.u32 4294901760, %v3065_v50  ;;  %v3098_v12 = vld [vmem:[#allocation2 + $0x218] sm:$0xff] }
  0x42   :  { %4649 = vst [vmem:[#allocation59_spill] sm:$0xff] %v3063_v21  ;;  %v464_v52 = vand.u32 4294901760, %v463_v46  ;;  %v475_v2 = vsub.f32 %v3026_v13, %v4650_v62  ;;  %v3083_v46 = vsub.f32 %v2928_v39, %v2959_v20  ;;  %v3085_v62 = vld [vmem:[#allocation2 + $0x228] sm:$0xff]  ;;  %216 = vmatprep.subr.mxu0 %v3072_v61  ;;  %v3096_v47 = vsub.f32 %v2951_v7, %v2979_v51 }
  0x43   :  { %v487_v1 = vsub.f32 %v3051_v38, %v4654_v14  ;;  %4655 = vst [vmem:[#allocation62_spill] sm:$0xff] %v3092_v27  ;;  %v482_v39 = vand.u32 4294901760, %v481_v49  ;;  %v3105_v14 = vand.u32 4294901760, %v3074_v34  ;;  %v3107_v38 = vld [vmem:[#allocation2 + $0x210] sm:$0xff]  ;;  %218 = vmatpush2.msra.mxu0 %v3092_v27  ;;  %v3116_v49 = vand.u32 4294901760, %v3085_v62 }
  0x44   :  { %4653 = vst [vmem:[#allocation61_spill] sm:$0xff] %v3083_v46  ;;  %465 = vmatprep.subr.mxu1 %v464_v52  ;;  %v476_v44 = vand.u32 4294901760, %v475_v2  ;;  %4656 = vst [vmem:[#allocation63_spill] sm:$0xff] %v3096_v47  ;;  %v4657_v52 = vand.u32 4294901760, %v3063_v21  ;;  %v4424_v7 = vand.u32 4294901760, %v3096_v47  ;;  %v4661_v51 = vand.u32 4294901760, %v3083_v46 }
  0x45   :  { %471 = vmatpush2.msra.mxu1 %v470_v28  ;;  %4658 = vst [vmem:[#allocation64_spill] sm:$0xff] %v3105_v14  ;;  %v488_v13 = vand.u32 4294901760, %v487_v1  ;;  %v3113_v28 = vsub.f32 %v2961_v32, %v2993_v41  ;;  %4660 = vst [vmem:[#allocation66_spill] sm:$0xff] %v3116_v49  ;;  %220 = vmatprep.subr.mxu0 %v3105_v14  ;;  %v3126_v1 = vsub.f32 %v2972_v33, %v3004_v53  ;;  %v3143_v33 = vld [vmem:[#allocation2 + $0x1f8] sm:$0xff] }
  0x46   :  { %v493_v2 = vsub.f32 %v3063_v21, %v4657_v52  ;;  %477 = vmatprep.subr.mxu1 %v476_v44  ;;  %v3118_v52 = vld [vmem:[#allocation2 + $0x200] sm:$0xff]  ;;  %v499_v44 = vsub.f32 %v3083_v46, %v4661_v51  ;;  %v3129_v32 = vand.u32 4294901760, %v3098_v12  ;;  %v505_v41 = vsub.f32 %v3096_v47, %v4424_v7  ;;  %222 = vmatpush2.msra.mxu0 %v3116_v49 }
  0x47   :  { %4659 = vst [vmem:[#allocation65_spill] sm:$0xff] %v3113_v28  ;;  %483 = vmatpush2.msra.mxu1 %v482_v39  ;;  %4662 = vst [vmem:[#allocation67_spill] sm:$0xff] %v3126_v1  ;;  %v3138_v51 = vsub.f32 %v2985_v19, %v3017_v36  ;;  %v3149_v7 = vsub.f32 %v2995_v30, %v3029_v26  ;;  %v3152_v39 = vand.u32 4294901760, %v3118_v52  ;;  %v3154_v19 = vld [vmem:[#allocation2 + $0x1e8] sm:$0xff]  ;;  %v4668_v47 = vand.u32 4294901760, %v3113_v28 }
  0x48   :  { %v494_v20 = vand.u32 4294901760, %v493_v2  ;;  %4663 = vst [vmem:[#allocation68_spill] sm:$0xff] %v3129_v32  ;;  %489 = vmatprep.subr.mxu1 %v488_v13  ;;  %v3141_v2 = vand.u32 4294901760, %v3107_v38  ;;  %v500_v53 = vand.u32 4294901760, %v499_v44  ;;  %v4435_v13 = vand.u32 4294901760, %v3126_v1  ;;  %224 = vmatprep.subr.mxu0 %v3129_v32 }
  0x49   :  { %4664 = vst [vmem:[#allocation69_spill] sm:$0xff] %v3138_v51  ;;  %4666 = vst [vmem:[#allocation71_spill] sm:$0xff] %v3149_v7  ;;  %v506_v36 = vand.u32 4294901760, %v505_v41  ;;  %v511_v46 = vsub.f32 %v3113_v28, %v4668_v47  ;;  %v3163_v44 = vsub.f32 %v3006_v24, %v3040_v56  ;;  %v3171_v41 = vand.u32 4294901760, %v3143_v33 }
  0x4a   :  { %4665 = vst [vmem:[#allocation70_spill] sm:$0xff] %v3141_v2  ;;  %495 = vmatpush2.msra.mxu1 %v494_v20  ;;  %4667 = vst [vmem:[#allocation72_spill] sm:$0xff] %v3152_v39  ;;  %226 = vmatpush2.msra.mxu0 %v3141_v2  ;;  %v517_v30 = vsub.f32 %v3126_v1, %v4435_v13  ;;  %v3175_v47 = vsub.f32 %v3031_v37, %v3059_v43  ;;  %v3177_v20 = vld [vmem:[#allocation2 + $0x1e0] sm:$0xff]  ;;  %v3184_v26 = vand.u32 4294901760, %v3154_v19  ;;  %v3186_v1 = vld [vmem:[#allocation2 + $0x1d0] sm:$0xff] }
  0x4b   :  { %4669 = vst [vmem:[#allocation73_spill] sm:$0xff] %v3163_v44  ;;  %501 = vmatprep.subr.mxu1 %v500_v53  ;;  %228 = vmatprep.subr.mxu0 %v3152_v39  ;;  %4670 = vst [vmem:[#allocation74_spill] sm:$0xff] %v3171_v41  ;;  %v512_v24 = vand.u32 4294901760, %v511_v46  ;;  %v4672_v53 = vand.u32 4294901760, %v3138_v51  ;;  %v4674_v21 = vand.u32 4294901760, %v3149_v7  ;;  %v3195_v46 = vsub.f32 %v3042_v29, %v3072_v61 }
  0x4c   :  { %4671 = vst [vmem:[#allocation75_spill] sm:$0xff] %v3175_v47  ;;  %507 = vmatpush2.msra.mxu1 %v506_v36  ;;  %4673 = vst [vmem:[#allocation76_spill] sm:$0xff] %v3184_v26  ;;  %v518_v28 = vand.u32 4294901760, %v517_v30  ;;  %230 = vmatpush2.msra.mxu0 %v3171_v41  ;;  %v4676_v43 = vand.u32 4294901760, %v3163_v44  ;;  %v3208_v36 = vsub.f32 %v3065_v50, %v3092_v27 }
  0x4d   :  { %v523_v56 = vsub.f32 %v3138_v51, %v4672_v53  ;;  %v529_v37 = vsub.f32 %v3149_v7, %v4674_v21  ;;  %4675 = vst [vmem:[#allocation77_spill] sm:$0xff] %v3195_v46  ;;  %v3197_v53 = vld [vmem:[#allocation2 + $0x1c8] sm:$0xff]  ;;  %513 = vmatprep.subr.mxu1 %v512_v24  ;;  %232 = vmatprep.subr.mxu0 %v3184_v26  ;;  %v3204_v21 = vand.u32 4294901760, %v3177_v20  ;;  %v3210_v7 = vld [vmem:[#allocation2 + $0x1b8] sm:$0xff]  ;;  %v4679_v24 = vand.u32 4294901760, %v3175_v47 }
  0x4e   :  { %v535_v30 = vsub.f32 %v3163_v44, %v4676_v43  ;;  %4678 = vst [vmem:[#allocation79_spill] sm:$0xff] %v3208_v36  ;;  %519 = vmatpush2.msra.mxu1 %v518_v28  ;;  %v3217_v43 = vand.u32 4294901760, %v3186_v1  ;;  %v3219_v44 = vld [vmem:[#allocation2 + $0x1b0] sm:$0xff]  ;;  %v4458_v50 = vand.u32 4294901760, %v3208_v36  ;;  %v3225_v28 = vsub.f32 %v3074_v34, %v3105_v14 }
  0x4f   :  { %v524_v13 = vand.u32 4294901760, %v523_v56  ;;  %4677 = vst [vmem:[#allocation78_spill] sm:$0xff] %v3204_v21  ;;  %v530_v29 = vand.u32 4294901760, %v529_v37  ;;  %v541_v56 = vsub.f32 %v3175_v47, %v4679_v24  ;;  %234 = vmatpush2.msra.mxu0 %v3204_v21  ;;  %v3228_v37 = vand.u32 4294901760, %v3197_v53  ;;  %v3230_v24 = vld [vmem:[#allocation2 + $0x1a0] sm:$0xff] }
  0x50   :  { %v536_v51 = vand.u32 4294901760, %v535_v30  ;;  %4680 = vst [vmem:[#allocation80_spill] sm:$0xff] %v3225_v28  ;;  %v4681_v27 = vand.u32 4294901760, %v3195_v46  ;;  %236 = vmatprep.subr.mxu0 %v3217_v43  ;;  %v3238_v30 = vsub.f32 %v3085_v62, %v3116_v49  ;;  %v3241_v34 = vand.u32 4294901760, %v3210_v7  ;;  %v3255_v62 = vld [vmem:[#allocation2 + $0x198] sm:$0xff] }
  0x51   :  { %525 = vmatprep.subr.mxu1 %v524_v13  ;;  %v542_v61 = vand.u32 4294901760, %v541_v56  ;;  %v553_v14 = vsub.f32 %v3208_v36, %v4458_v50  ;;  %238 = vmatpush2.msra.mxu0 %v3228_v37  ;;  %v3253_v56 = vand.u32 4294901760, %v3219_v44  ;;  %v3261_v50 = vsub.f32 %v3107_v38, %v3141_v2 }
  0x52   :  { %531 = vmatpush2.msra.mxu1 %v530_v29  ;;  %v547_v13 = vsub.f32 %v3195_v46, %v4681_v27  ;;  %4682 = vst [vmem:[#allocation81_spill] sm:$0xff] %v3238_v30  ;;  %4683 = vst [vmem:[#allocation82_spill] sm:$0xff] %v3241_v34  ;;  %v3250_v27 = vsub.f32 %v3098_v12, %v3129_v32  ;;  %240 = vmatprep.subr.mxu0 %v3241_v34  ;;  %v3264_v29 = vand.u32 4294901760, %v3230_v24  ;;  %v3266_v12 = vld [vmem:[#allocation2 + $0x188] sm:$0xff] }
  0x53   :  { %537 = vmatprep.subr.mxu1 %v536_v51  ;;  %4685 = vst [vmem:[#allocation84_spill] sm:$0xff] %v3253_v56  ;;  %v4469_v51 = vand.u32 4294901760, %v3238_v30  ;;  %4686 = vst [vmem:[#allocation85_spill] sm:$0xff] %v3261_v50  ;;  %v554_v32 = vand.u32 4294901760, %v553_v14  ;;  %v4688_v36 = vand.u32 4294901760, %v3225_v28  ;;  %242 = vmatpush2.msra.mxu0 %v3253_v56  ;;  %v3283_v14 = vand.u32 4294901760, %v3255_v62 }
  0x54   :  { %4684 = vst [vmem:[#allocation83_spill] sm:$0xff] %v3250_v27  ;;  %543 = vmatpush2.msra.mxu1 %v542_v61  ;;  %v548_v49 = vand.u32 4294901760, %v547_v13  ;;  %4687 = vst [vmem:[#allocation86_spill] sm:$0xff] %v3264_v29  ;;  %v3275_v13 = vsub.f32 %v3118_v52, %v3152_v39  ;;  %244 = vmatprep.subr.mxu0 %v3264_v29  ;;  %v3289_v61 = vld [vmem:[#allocation2 + $0x180] sm:$0xff]  ;;  %v3296_v2 = vand.u32 4294901760, %v3266_v12 }
  0x55   :  { %v559_v46 = vsub.f32 %v3225_v28, %v4688_v36  ;;  %v565_v38 = vsub.f32 %v3238_v30, %v4469_v51  ;;  %v3287_v36 = vsub.f32 %v3143_v33, %v3171_v41  ;;  %v26_v30 = vld [vmem:[%s4302_s0 + $0x8] sm:$0xff]  ;;  %v4692_v33 = vand.u32 4294901760, %v3261_v50  ;;  %246 = vmatpush2.msra.mxu0 %v3283_v14 }
  0x56   :  { %4689 = vst [vmem:[#allocation87_spill] sm:$0xff] %v3275_v13  ;;  %549 = vmatprep.subr.mxu1 %v548_v49  ;;  %v4691_v49 = vand.u32 4294901760, %v3250_v27  ;;  %248 = vmatprep.subr.mxu0 %v3296_v2 }
  0x57   :  { %4690 = vst [vmem:[#allocation88_spill] sm:$0xff] %v3287_v36  ;;  %555 = vmatpush2.msra.mxu1 %v554_v32  ;;  %v560_v52 = vand.u32 4294901760, %v559_v46  ;;  %v566_v28 = vand.u32 4294901760, %v565_v38  ;;  %v577_v41 = vsub.f32 %v3261_v50, %v4692_v33  ;;  %v3308_v46 = vsub.f32 %v3154_v19, %v3184_v26 }
  0x58   :  { %v571_v39 = vsub.f32 %v3250_v27, %v4691_v49  ;;  %v25_v49 = vld [vmem:[%s4302_s0] sm:$0xff]  ;;  %v4694_v38 = vand.u32 4294901760, %v3275_v13  ;;  %v3318_v33 = vand.u32 4294901760, %v3289_v61  ;;  %v3322_v32 = vsub.f32 %v3177_v20, %v3204_v21 }
  0x59   :  { %4693 = vst [vmem:[#allocation89_spill] sm:$0xff] %v3308_v46  ;;  %561 = vmatprep.subr.mxu1 %v560_v52  ;;  %v578_v19 = vand.u32 4294901760, %v577_v41  ;;  %v4696_v26 = vand.u32 4294901760, %v3287_v36  ;;  %v3328_v50 = vand.u32 4294901760, %v26_v30  ;;  %v3334_v20 = vsub.f32 %v3186_v1, %v3217_v43 }
  0x5a   :  { %v572_v51 = vand.u32 4294901760, %v571_v39  ;;  %v583_v27 = vsub.f32 %v3275_v13, %v4694_v38  ;;  %4695 = vst [vmem:[#allocation90_spill] sm:$0xff] %v3322_v32  ;;  %567 = vmatpush2.msra.mxu1 %v566_v28  ;;  %v4487_v39 = vand.u32 4294901760, %v3308_v46  ;;  %250 = vmatpush2.msra.mxu0 %v3318_v33  ;;  %v4486_v13 = vand.u32 4294901760, %v3322_v32 }
  0x5b   :  { %v589_v52 = vsub.f32 %v3287_v36, %v4696_v26  ;;  %4697 = vst [vmem:[#allocation91_spill] sm:$0xff] %v3328_v50  ;;  %4698 = vst [vmem:[#allocation92_spill] sm:$0xff] %v3334_v20  ;;  %v3336_v28 = vand.u32 4294901760, %v25_v49  ;;  %v3342_v21 = vsub.f32 %v26_v30, %v3328_v50  ;;  %663 = vmatprep.subr.mxu0 %v2554_v18  ;;  %653 = vmatprep.mubr.f32.mxu1 %v3328_v50 }
  0x5c   :  { %573 = vmatprep.subr.mxu1 %v572_v51  ;;  %v584_v38 = vand.u32 4294901760, %v583_v27  ;;  %v595_v26 = vsub.f32 %v3308_v46, %v4487_v39  ;;  %v3347_v27 = vsub.f32 %v3197_v53, %v3228_v37  ;;  %v601_v1 = vsub.f32 %v3322_v32, %v4486_v13 }
  0x5d   :  { %4699 = vst [vmem:[#allocation93_spill] sm:$0xff] %v3336_v28  ;;  %579 = vmatpush2.msra.mxu1 %v578_v19  ;;  %v590_v41 = vand.u32 4294901760, %v589_v52  ;;  %4700 = vst [vmem:[#allocation94_spill] sm:$0xff] %v3342_v21  ;;  %v4490_v51 = vand.u32 4294901760, %v3334_v20  ;;  %v3354_v19 = vsub.f32 %v25_v49, %v3336_v28  ;;  %v3358_v30 = vsub.f32 %v3210_v7, %v3241_v34 }
  0x5e   :  { %4701 = vst [vmem:[#allocation95_spill] sm:$0xff] %v3347_v27  ;;  %585 = vmatprep.subr.mxu1 %v584_v38  ;;  %v596_v52 = vand.u32 4294901760, %v595_v26  ;;  %v3362_v53 = vand.u32 4294901760, %v3342_v21  ;;  %v4495_v38 = vand.u32 4294901760, %v3347_v27  ;;  %v3367_v13 = vsub.f32 %v3219_v44, %v3253_v56 }
  0x5f   :  { %4702 = vst [vmem:[#allocation96_spill] sm:$0xff] %v3354_v19  ;;  %4703 = vst [vmem:[#allocation97_spill] sm:$0xff] %v3358_v30  ;;  %591 = vmatpush2.msra.mxu1 %v590_v41  ;;  %v602_v39 = vand.u32 4294901760, %v601_v1  ;;  %v607_v49 = vsub.f32 %v3334_v20, %v4490_v51  ;;  %v3373_v7 = vand.u32 4294901760, %v3354_v19  ;;  %v4502_v41 = vand.u32 4294901760, %v3358_v30 }
  0x60   :  { %4704 = vst [vmem:[#allocation98_spill] sm:$0xff] %v3362_v53  ;;  %597 = vmatprep.subr.mxu1 %v596_v52  ;;  %v254_v26 = vsub.f32 %v3342_v21, %v3362_v53  ;;  %v613_v50 = vsub.f32 %v3347_v27, %v4495_v38  ;;  %v3384_v1 = vsub.f32 %v3230_v24, %v3264_v29  ;;  %v4709_v34 = vand.u32 4294901760, %v3367_v13 }
  0x61   :  { %4705 = vst [vmem:[#allocation99_spill] sm:$0xff] %v3373_v7  ;;  %603 = vmatpush2.msra.mxu1 %v602_v39  ;;  %v608_v51 = vand.u32 4294901760, %v607_v49  ;;  %v260_v56 = vsub.f32 %v3354_v19, %v3373_v7  ;;  %v619_v52 = vsub.f32 %v3358_v30, %v4502_v41  ;;  %v3393_v53 = vsub.f32 %v3255_v62, %v3283_v14 }
  0x62   :  { %4706 = vst [vmem:[#allocation100_spill] sm:$0xff] %v3384_v1  ;;  %v3395_v38 = vand.u32 4294901760, %v254_v26  ;;  %v614_v44 = vand.u32 4294901760, %v613_v50  ;;  %v625_v24 = vsub.f32 %v3367_v13, %v4709_v34  ;;  %v4506_v39 = vand.u32 4294901760, %v3384_v1 }
  0x63   :  { %4707 = vst [vmem:[#allocation101_spill] sm:$0xff] %v3393_v53  ;;  %609 = vmatprep.subr.mxu1 %v608_v51  ;;  %v3401_v49 = vand.u32 4294901760, %v260_v56  ;;  %v620_v7 = vand.u32 4294901760, %v619_v52  ;;  %v4505_v29 = vand.u32 4294901760, %v3393_v53  ;;  %v3406_v41 = vsub.f32 %v3266_v12, %v3296_v2 }
  0x64   :  { %4708 = vst [vmem:[#allocation102_spill] sm:$0xff] %v3395_v38  ;;  %256 = vmatprep.mubr.f32.mxu0 %v3395_v38  ;;  %615 = vmatpush2.msra.mxu1 %v614_v44  ;;  %v626_v50 = vand.u32 4294901760, %v625_v24  ;;  %v631_v34 = vsub.f32 %v3384_v1, %v4506_v39  ;;  %v3414_v62 = vsub.f32 %v3289_v61, %v3318_v33  ;;  %v4724_v39 = vld [vmem:[#allocation11_spill] sm:$0xff]  ;;  %v4727_v38 = vld [vmem:[#allocation37_spill] sm:$0xff] }
  0x65   :  { %4710 = vst [vmem:[#allocation103_spill] sm:$0xff] %v3401_v49  ;;  %262 = vmatmul.mubr.f32.vlgmr.msra.gmra.mxu0 %v3401_v49  ;;  %621 = vmatprep.subr.mxu1 %v620_v7  ;;  %v637_v56 = vsub.f32 %v3393_v53, %v4505_v29  ;;  %v4504_v12 = vand.u32 4294901760, %v3406_v41  ;;  %v4723_v29 = vld [vmem:[#allocation33_spill] sm:$0xff]  ;;  %v4726_v49 = vld [vmem:[#allocation12_spill] sm:$0xff] }
  0x66   :  { %4711 = vst [vmem:[#allocation104_spill] sm:$0xff] %v3414_v62  ;;  %666 = vmatpush1.msra.mxu0 %v2567_v23  ;;  %627 = vmatpush2.msra.mxu1 %v626_v50  ;;  %v632_v51 = vand.u32 4294901760, %v631_v34  ;;  %v4503_v26 = vand.u32 4294901760, %v3414_v62  ;;  %v4712_v50 = vld [vmem:[#allocation5_spill] sm:$0xff]  ;;  %v4713_v34 = vld [vmem:[#allocation23_spill] sm:$0xff] }
  0x67   :  { %669 = vmatprep.subr.mxu0 %v2573_v25  ;;  %v638_v44 = vand.u32 4294901760, %v637_v56  ;;  %v643_v61 = vsub.f32 %v3406_v41, %v4504_v12  ;;  %855 = vmatprep.mubr.f32.mxu0 %v3342_v21  ;;  %v4714_v56 = vld [vmem:[#allocation6_spill] sm:$0xff]  ;;  %v4725_v21 = vld [vmem:[#allocation35_spill] sm:$0xff] }
  0x68   :  { %672 = vmatpush1.msra.mxu0 %v2587_v31  ;;  %633 = vmatprep.subr.mxu1 %v632_v51  ;;  %v649_v7 = vsub.f32 %v3414_v62, %v4503_v26  ;;  %v4715_v51 = vld [vmem:[#allocation25_spill] sm:$0xff]  ;;  %v4721_v26 = vld [vmem:[#allocation31_spill] sm:$0xff]  ;;  %v4722_v12 = vld [vmem:[#allocation10_spill] sm:$0xff] }
  0x69   :  { %675 = vmatprep.subr.mxu0 %v2596_v35  ;;  %639 = vmatpush2.msra.mxu1 %v638_v44  ;;  %v644_v52 = vand.u32 4294901760, %v643_v61  ;;  %v4716_v44 = vld [vmem:[#allocation7_spill] sm:$0xff] }
  0x6a   :  { %678 = vmatpush1.msra.mxu0 %v2609_v40  ;;  %v650_v24 = vand.u32 4294901760, %v649_v7  ;;  %v4717_v61 = vld [vmem:[#allocation27_spill] sm:$0xff]  ;;  %v4718_v7 = vld [vmem:[#allocation8_spill] sm:$0xff] }
  0x6b   :  { %645 = vmatprep.subr.mxu1 %v644_v52  ;;  %681 = vmatprep.subr.mxu0 %v2623_v45  ;;  %v4719_v52 = vld [vmem:[#allocation29_spill] sm:$0xff] }
  0x6c   :  { %651 = vmatpush2.msra.mxu1 %v650_v24  ;;  %684 = vmatpush1.msra.mxu0 %v2649_v59  ;;  %v4720_v24 = vld [vmem:[#allocation9_spill] sm:$0xff] }
  0x6d   :  { %655 = vmatmul.mubr.f32.vlgmr.msra.gmra.mxu1 %v3336_v28  ;;  %687 = vmatprep.subr.mxu0 %v2661_v0  ;;  %v4728_v28 = vld [vmem:[#allocation13_spill] sm:$0xff] }
  0x6e   :  { %865 = vmatprep.subr.mxu1 %v2534_v3  ;;  %690 = vmatpush1.msra.mxu0 %v2672_v8 }
  0x6f   :  { %867 = vmatpush1.msra.mxu1 %v2536_v4  ;;  %693 = vmatprep.subr.mxu0 %v2683_v42 }
  0x70   :  { %869 = vmatprep.subr.mxu1 %v2538_v5  ;;  %696 = vmatpush1.msra.mxu0 %v2695_v48 }
  0x71   :  { %871 = vmatpush1.msra.mxu1 %v2540_v9  ;;  %699 = vmatprep.subr.mxu0 %v2709_v57 }
  0x72   :  { %873 = vmatprep.subr.mxu1 %v2542_v10  ;;  %702 = vmatpush1.msra.mxu0 %v2721_v6 }
  0x73   :  { %875 = vmatpush1.msra.mxu1 %v2544_v11  ;;  %705 = vmatprep.subr.mxu0 %v2742_v54 }
  0x74   :  { %877 = vmatprep.subr.mxu1 %v2547_v15  ;;  %708 = vmatpush1.msra.mxu0 %v2755_v63 }
  0x75   :  { %879 = vmatpush1.msra.mxu1 %v2549_v16  ;;  %711 = vmatprep.subr.mxu0 %v2773_v55 }
  0x76   :  { %881 = vmatprep.subr.mxu1 %v2551_v17  ;;  %714 = vmatpush1.msra.mxu0 %v2786_v58 }
  0x77   :  { %883 = vmatpush1.msra.mxu1 %v2564_v22  ;;  %717 = vmatprep.subr.mxu0 %v2798_v60 }
  0x78   :  { %885 = vmatprep.subr.mxu1 %v4712_v50  ;;  %720 = vmatpush1.msra.mxu0 %v4713_v34 }
  0x79   :  { %887 = vmatpush1.msra.mxu1 %v4714_v56  ;;  %723 = vmatprep.subr.mxu0 %v4715_v51 }
  0x7a   :  { %889 = vmatprep.subr.mxu1 %v4716_v44  ;;  %726 = vmatpush1.msra.mxu0 %v4717_v61 }
  0x7b   :  { %891 = vmatpush1.msra.mxu1 %v4718_v7  ;;  %729 = vmatprep.subr.mxu0 %v4719_v52  ;;  %v4729_v7 = vld [vmem:[#allocation39_spill] sm:$0xff]  ;;  %v4730_v52 = vld [vmem:[#allocation14_spill] sm:$0xff] }
  0x7c   :  { %893 = vmatprep.subr.mxu1 %v4720_v24  ;;  %732 = vmatpush1.msra.mxu0 %v4721_v26  ;;  %v4731_v24 = vld [vmem:[#allocation41_spill] sm:$0xff]  ;;  %v4732_v26 = vld [vmem:[#allocation15_spill] sm:$0xff] }
  0x7d   :  { %895 = vmatpush1.msra.mxu1 %v4722_v12  ;;  %735 = vmatprep.subr.mxu0 %v4723_v29  ;;  %v4733_v12 = vld [vmem:[#allocation43_spill] sm:$0xff]  ;;  %v4734_v29 = vld [vmem:[#allocation16_spill] sm:$0xff] }
  0x7e   :  { %897 = vmatprep.subr.mxu1 %v4724_v39  ;;  %738 = vmatpush1.msra.mxu0 %v4725_v21  ;;  %v4735_v39 = vld [vmem:[#allocation45_spill] sm:$0xff] }
  0x7f   :  { %899 = vmatpush1.msra.mxu1 %v4726_v49  ;;  %741 = vmatprep.subr.mxu0 %v4727_v38  ;;  %v4736_v21 = vld [vmem:[#allocation17_spill] sm:$0xff]  ;;  %v4737_v49 = vld [vmem:[#allocation47_spill] sm:$0xff]  ;;  %v4738_v38 = vld [vmem:[#allocation18_spill] sm:$0xff] }
  0x80   :  { %901 = vmatprep.subr.mxu1 %v4728_v28  ;;  %744 = vmatpush1.msra.mxu0 %v4729_v7  ;;  %v4739_v28 = vld [vmem:[#allocation49_spill] sm:$0xff]  ;;  %v4740_v7 = vld [vmem:[#allocation19_spill] sm:$0xff] }
  0x81   :  { %903 = vmatpush1.msra.mxu1 %v4730_v52  ;;  %747 = vmatprep.subr.mxu0 %v4731_v24  ;;  %v4741_v52 = vld [vmem:[#allocation51_spill] sm:$0xff]  ;;  %v4742_v24 = vld [vmem:[#allocation20_spill] sm:$0xff] }
  0x82   :  { %905 = vmatprep.subr.mxu1 %v4732_v26  ;;  %750 = vmatpush1.msra.mxu0 %v4733_v12  ;;  %v4743_v26 = vld [vmem:[#allocation53_spill] sm:$0xff] }
  0x83   :  { %907 = vmatpush1.msra.mxu1 %v4734_v29  ;;  %753 = vmatprep.subr.mxu0 %v4735_v39  ;;  %v4744_v12 = vld [vmem:[#allocation21_spill] sm:$0xff]  ;;  %v4745_v29 = vld [vmem:[#allocation55_spill] sm:$0xff]  ;;  %v4746_v39 = vld [vmem:[#allocation22_spill] sm:$0xff] }
  0x84   :  { %909 = vmatprep.subr.mxu1 %v4736_v21  ;;  %756 = vmatpush1.msra.mxu0 %v4737_v49  ;;  %v4747_v21 = vld [vmem:[#allocation57_spill] sm:$0xff]  ;;  %v4748_v49 = vld [vmem:[#allocation24_spill] sm:$0xff] }
  0x85   :  { %911 = vmatpush1.msra.mxu1 %v4738_v38  ;;  %759 = vmatprep.subr.mxu0 %v4739_v28  ;;  %v4749_v38 = vld [vmem:[#allocation59_spill] sm:$0xff]  ;;  %v4750_v28 = vld [vmem:[#allocation26_spill] sm:$0xff] }
  0x86   :  { %913 = vmatprep.subr.mxu1 %v4740_v7  ;;  %762 = vmatpush2.msra.mxu0 %v4741_v52  ;;  %v4751_v7 = vld [vmem:[#allocation61_spill] sm:$0xff]  ;;  %v4752_v52 = vld [vmem:[#allocation28_spill] sm:$0xff] }
  0x87   :  { %915 = vmatpush1.msra.mxu1 %v4742_v24  ;;  %765 = vmatprep.subr.mxu0 %v4743_v26  ;;  %v4753_v24 = vld [vmem:[#allocation63_spill] sm:$0xff]  ;;  %v4754_v26 = vld [vmem:[#allocation30_spill] sm:$0xff] }
  0x88   :  { %917 = vmatprep.subr.mxu1 %v4744_v12  ;;  %768 = vmatpush2.msra.mxu0 %v4745_v29  ;;  %v4755_v12 = vld [vmem:[#allocation65_spill] sm:$0xff]  ;;  %v4756_v29 = vld [vmem:[#allocation32_spill] sm:$0xff] }
  0x89   :  { %919 = vmatpush1.msra.mxu1 %v4746_v39  ;;  %771 = vmatprep.subr.mxu0 %v4747_v21  ;;  %v4757_v39 = vld [vmem:[#allocation67_spill] sm:$0xff]  ;;  %v4758_v21 = vld [vmem:[#allocation34_spill] sm:$0xff] }
  0x8a   :  { %921 = vmatprep.subr.mxu1 %v4748_v49  ;;  %774 = vmatpush2.msra.mxu0 %v4749_v38  ;;  %v4759_v49 = vld [vmem:[#allocation69_spill] sm:$0xff]  ;;  %v4760_v38 = vld [vmem:[#allocation36_spill] sm:$0xff] }
  0x8b   :  { %923 = vmatpush1.msra.mxu1 %v4750_v28  ;;  %777 = vmatprep.subr.mxu0 %v4751_v7  ;;  %v4761_v28 = vld [vmem:[#allocation71_spill] sm:$0xff]  ;;  %v4762_v7 = vld [vmem:[#allocation38_spill] sm:$0xff] }
  0x8c   :  { %925 = vmatprep.subr.mxu1 %v4752_v52  ;;  %780 = vmatpush2.msra.mxu0 %v4753_v24  ;;  %v4763_v52 = vld [vmem:[#allocation73_spill] sm:$0xff]  ;;  %v4764_v24 = vld [vmem:[#allocation40_spill] sm:$0xff] }
  0x8d   :  { %927 = vmatpush1.msra.mxu1 %v4754_v26  ;;  %783 = vmatprep.subr.mxu0 %v4755_v12  ;;  %v4765_v12 = vld [vmem:[#allocation42_spill] sm:$0xff] }
  0x8e   :  { %929 = vmatprep.subr.mxu1 %v4756_v29  ;;  %786 = vmatpush2.msra.mxu0 %v4757_v39  ;;  %v4766_v29 = vld [vmem:[#allocation77_spill] sm:$0xff]  ;;  %v4767_v39 = vld [vmem:[#allocation44_spill] sm:$0xff] }
  0x8f   :  { %931 = vmatpush2.msra.mxu1 %v4758_v21  ;;  %789 = vmatprep.subr.mxu0 %v4759_v49  ;;  %v4768_v21 = vld [vmem:[#allocation79_spill] sm:$0xff]  ;;  %v4769_v49 = vld [vmem:[#allocation46_spill] sm:$0xff] }
  0x90   :  { %933 = vmatprep.subr.mxu1 %v4760_v38  ;;  %792 = vmatpush2.msra.mxu0 %v4761_v28  ;;  %v4770_v38 = vld [vmem:[#allocation80_spill] sm:$0xff] }
  0x91   :  { %935 = vmatpush2.msra.mxu1 %v4762_v7  ;;  %795 = vmatprep.subr.mxu0 %v4763_v52  ;;  %v4771_v28 = vld [vmem:[#allocation48_spill] sm:$0xff]  ;;  %v4772_v7 = vld [vmem:[#allocation81_spill] sm:$0xff]  ;;  %v4773_v52 = vld [vmem:[#allocation50_spill] sm:$0xff] }
  0x92   :  { %937 = vmatprep.subr.mxu1 %v4764_v24  ;;  %798 = vmatpush2.msra.mxu0 %v3175_v47  ;;  %v4774_v24 = vld [vmem:[#allocation83_spill] sm:$0xff]  ;;  %v4775_v47 = vld [vmem:[#allocation52_spill] sm:$0xff] }
  0x93   :  { %939 = vmatpush2.msra.mxu1 %v4765_v12  ;;  %801 = vmatprep.subr.mxu0 %v4766_v29  ;;  %v4776_v12 = vld [vmem:[#allocation85_spill] sm:$0xff]  ;;  %v4777_v29 = vld [vmem:[#allocation54_spill] sm:$0xff] }
  0x94   :  { %941 = vmatprep.subr.mxu1 %v4767_v39  ;;  %804 = vmatpush2.msra.mxu0 %v4768_v21  ;;  %v4778_v39 = vld [vmem:[#allocation87_spill] sm:$0xff]  ;;  %v4779_v21 = vld [vmem:[#allocation56_spill] sm:$0xff] }
  0x95   :  { %943 = vmatpush2.msra.mxu1 %v4769_v49  ;;  %807 = vmatprep.subr.mxu0 %v4770_v38  ;;  %v4780_v38 = vld [vmem:[#allocation58_spill] sm:$0xff] }
  0x96   :  { %945 = vmatprep.subr.mxu1 %v4771_v28  ;;  %810 = vmatpush2.msra.mxu0 %v4772_v7  ;;  %v4781_v7 = vld [vmem:[#allocation60_spill] sm:$0xff] }
  0x97   :  { %947 = vmatpush2.msra.mxu1 %v4773_v52  ;;  %813 = vmatprep.subr.mxu0 %v4774_v24  ;;  %v4782_v24 = vld [vmem:[#allocation62_spill] sm:$0xff] }
  0x98   :  { %949 = vmatprep.subr.mxu1 %v4775_v47  ;;  %816 = vmatpush2.msra.mxu0 %v4776_v12  ;;  %v4783_v12 = vld [vmem:[#allocation64_spill] sm:$0xff] }
  0x99   :  { %951 = vmatpush2.msra.mxu1 %v4777_v29  ;;  %819 = vmatprep.subr.mxu0 %v4778_v39  ;;  %v4784_v39 = vld [vmem:[#allocation66_spill] sm:$0xff] }
  0x9a   :  { %953 = vmatprep.subr.mxu1 %v4779_v21  ;;  %822 = vmatpush2.msra.mxu0 %v3287_v36  ;;  %v4785_v36 = vld [vmem:[#allocation68_spill] sm:$0xff] }
  0x9b   :  { %955 = vmatpush2.msra.mxu1 %v4780_v38  ;;  %825 = vmatprep.subr.mxu0 %v3308_v46  ;;  %v4786_v46 = vld [vmem:[#allocation70_spill] sm:$0xff] }
  0x9c   :  { %957 = vmatprep.subr.mxu1 %v4781_v7  ;;  %828 = vmatpush2.msra.mxu0 %v3322_v32  ;;  %v4787_v32 = vld [vmem:[#allocation72_spill] sm:$0xff] }
  0x9d   :  { %959 = vmatpush2.msra.mxu1 %v4782_v24  ;;  %831 = vmatprep.subr.mxu0 %v3334_v20  ;;  %v4788_v20 = vld [vmem:[#allocation74_spill] sm:$0xff] }
  0x9e   :  { %961 = vmatprep.subr.mxu1 %v4783_v12  ;;  %834 = vmatpush2.msra.mxu0 %v3347_v27  ;;  %v4789_v27 = vld [vmem:[#allocation76_spill] sm:$0xff] }
  0x9f   :  { %963 = vmatpush2.msra.mxu1 %v4784_v39  ;;  %837 = vmatprep.subr.mxu0 %v3358_v30  ;;  %v4790_v30 = vld [vmem:[#allocation78_spill] sm:$0xff] }
  0xa0   :  { %965 = vmatprep.subr.mxu1 %v4785_v36  ;;  %840 = vmatpush2.msra.mxu0 %v3367_v13 }
  0xa1   :  { %967 = vmatpush2.msra.mxu1 %v4786_v46  ;;  %843 = vmatprep.subr.mxu0 %v3384_v1  ;;  %v4791_v1 = vand.u32 4294901760, %v2554_v18  ;;  %v4798_v18 = vand.u32 4294901760, %v2596_v35  ;;  %v4804_v35 = vand.u32 4294901760, %v2661_v0  ;;  %v4808_v0 = vand.u32 4294901760, %v2709_v57  ;;  %v4824_v57 = vld [vmem:[#allocation10_spill] sm:$0xff] }
  0xa2   :  { %969 = vmatprep.subr.mxu1 %v4787_v32  ;;  %846 = vmatpush2.msra.mxu0 %v3393_v53  ;;  %v4792_v53 = vand.u32 4294901760, %v2567_v23  ;;  %v4799_v23 = vand.u32 4294901760, %v2609_v40  ;;  %v4805_v40 = vand.u32 4294901760, %v2672_v8  ;;  %v4818_v8 = vld [vmem:[#allocation8_spill] sm:$0xff] }
  0xa3   :  { %971 = vmatpush2.msra.mxu1 %v4788_v20  ;;  %849 = vmatprep.subr.mxu0 %v3406_v41  ;;  %v4793_v20 = vld [vmem:[#allocation82_spill] sm:$0xff] }
  0xa4   :  { %973 = vmatprep.subr.mxu1 %v4789_v27  ;;  %852 = vmatpush2.msra.mxu0 %v3414_v62  ;;  %v4794_v27 = vand.u32 4294901760, %v2573_v25  ;;  %v4795_v62 = vld [vmem:[#allocation84_spill] sm:$0xff]  ;;  %v4800_v25 = vand.u32 4294901760, %v2623_v45  ;;  %v4806_v45 = vand.u32 4294901760, %v2683_v42  ;;  %v4821_v42 = vld [vmem:[#allocation9_spill] sm:$0xff] }
  0xa5   :  { %975 = vmatpush2.msra.mxu1 %v4790_v30  ;;  %858 = vmatmul.mubr.f32.vlgmr.msra.gmra.mxu0 %v3354_v19  ;;  %v4796_v30 = vand.u32 4294901760, %v2587_v31  ;;  %v4797_v19 = vld [vmem:[#allocation86_spill] sm:$0xff]  ;;  %v4802_v31 = vand.u32 4294901760, %v2649_v59  ;;  %v4807_v59 = vand.u32 4294901760, %v2695_v48  ;;  %v4822_v48 = vld [vmem:[#allocation31_spill] sm:$0xff] }
  0xa6   :  { %977 = vmatprep.subr.mxu1 %v3217_v43  ;;  %1008 = vmatprep.subr.mxu0 %v4791_v1  ;;  %v4830_v1 = vld [vmem:[#allocation12_spill] sm:$0xff] }
  0xa7   :  { %979 = vmatpush2.msra.mxu1 %v3228_v37  ;;  %1012 = vmatpush1.msra.mxu0 %v4792_v53 }
  0xa8   :  { %981 = vmatprep.subr.mxu1 %v4793_v20  ;;  %1016 = vmatprep.subr.mxu0 %v4794_v27  ;;  %v4801_v27 = vld [vmem:[#allocation98_spill] sm:$0xff] }
  0xa9   :  { %983 = vmatpush2.msra.mxu1 %v4795_v62  ;;  %1020 = vmatpush1.msra.mxu0 %v4796_v30  ;;  %v4803_v30 = vld [vmem:[#allocation99_spill] sm:$0xff] }
  0xaa   :  { %985 = vmatprep.subr.mxu1 %v4797_v19  ;;  %1024 = vmatprep.subr.mxu0 %v4798_v18  ;;  %v4837_v18 = vld [vmem:[#allocation41_spill] sm:$0xff] }
  0xab   :  { %987 = vmatpush2.msra.mxu1 %v3283_v14  ;;  %1028 = vmatpush1.msra.mxu0 %v4799_v23  ;;  %v4838_v23 = vand.u32 4294901760, %v4837_v18  ;;  %v4874_v18 = vld [vmem:[#allocation32_spill] sm:$0xff] }
  0xac   :  { %989 = vmatprep.subr.mxu1 %v3296_v2  ;;  %1032 = vmatprep.subr.mxu0 %v4800_v25  ;;  %v4839_v25 = vld [vmem:[#allocation15_spill] sm:$0xff] }
  0xad   :  { %991 = vmatpush2.msra.mxu1 %v3318_v33  ;;  %995 = vmatprep.mubr.f32.mxu1 %v4801_v27 }
  0xae   :  { %1036 = vmatpush1.msra.mxu0 %v4802_v31  ;;  %999 = vmatmul.mubr.f32.vlgmr.msra.gmra.mxu1 %v4803_v30  ;;  %v4840_v31 = vld [vmem:[#allocation43_spill] sm:$0xff] }
  0xaf   :  { %1040 = vmatprep.subr.mxu0 %v4804_v35  ;;  %1271 = vmatprep.subr.mxu1 %v2534_v3  ;;  %v4809_v3 = vand.u32 4294901760, %v2721_v6  ;;  %v4841_v35 = vand.u32 4294901760, %v4840_v31  ;;  %v4877_v31 = vld [vmem:[#allocation34_spill] sm:$0xff] }
  0xb0   :  { %1044 = vmatpush1.msra.mxu0 %v4805_v40  ;;  %1273 = vmatpush1.msra.mxu1 %v2536_v4  ;;  %v4810_v4 = vand.u32 4294901760, %v2742_v54  ;;  %v4823_v54 = vand.u32 4294901760, %v4822_v48  ;;  %v4842_v40 = vld [vmem:[#allocation16_spill] sm:$0xff] }
  0xb1   :  { %1048 = vmatprep.subr.mxu0 %v4806_v45  ;;  %1275 = vmatprep.subr.mxu1 %v2538_v5  ;;  %v4811_v5 = vand.u32 4294901760, %v2755_v63  ;;  %v4825_v63 = vld [vmem:[#allocation33_spill] sm:$0xff] }
  0xb2   :  { %1052 = vmatpush1.msra.mxu0 %v4807_v59  ;;  %1277 = vmatpush1.msra.mxu1 %v2540_v9  ;;  %v4812_v9 = vand.u32 4294901760, %v2773_v55  ;;  %v4826_v6 = vand.u32 4294901760, %v4825_v63  ;;  %v4827_v55 = vld [vmem:[#allocation11_spill] sm:$0xff]  ;;  %v4843_v45 = vld [vmem:[#allocation45_spill] sm:$0xff] }
  0xb3   :  { %1056 = vmatprep.subr.mxu0 %v4808_v0  ;;  %1279 = vmatprep.subr.mxu1 %v2542_v10  ;;  %v4813_v10 = vand.u32 4294901760, %v2786_v58  ;;  %v4828_v58 = vld [vmem:[#allocation35_spill] sm:$0xff]  ;;  %v4844_v59 = vand.u32 4294901760, %v4843_v45  ;;  %v4845_v0 = vld [vmem:[#allocation17_spill] sm:$0xff]  ;;  %v4880_v45 = vld [vmem:[#allocation36_spill] sm:$0xff] }
  0xb4   :  { %1060 = vmatpush1.msra.mxu0 %v4809_v3  ;;  %1281 = vmatpush1.msra.mxu1 %v2544_v11  ;;  %v4814_v11 = vand.u32 4294901760, %v2798_v60  ;;  %v4829_v53 = vand.u32 4294901760, %v4828_v58  ;;  %v4846_v3 = vld [vmem:[#allocation47_spill] sm:$0xff] }
  0xb5   :  { %1064 = vmatprep.subr.mxu0 %v4810_v4  ;;  %1283 = vmatprep.subr.mxu1 %v2547_v15  ;;  %v4815_v15 = vand.u32 4294901760, %v4713_v34  ;;  %v4847_v4 = vand.u32 4294901760, %v4846_v3  ;;  %v4883_v3 = vld [vmem:[#allocation38_spill] sm:$0xff] }
  0xb6   :  { %1068 = vmatpush1.msra.mxu0 %v4811_v5  ;;  %1285 = vmatpush1.msra.mxu1 %v2549_v16  ;;  %v4816_v16 = vand.u32 4294901760, %v4715_v51  ;;  %v4834_v51 = vld [vmem:[#allocation39_spill] sm:$0xff]  ;;  %v4848_v5 = vld [vmem:[#allocation18_spill] sm:$0xff] }
  0xb7   :  { %1072 = vmatprep.subr.mxu0 %v4812_v9  ;;  %1287 = vmatprep.subr.mxu1 %v2551_v17  ;;  %v4817_v17 = vand.u32 4294901760, %v4717_v61  ;;  %v4836_v61 = vld [vmem:[#allocation14_spill] sm:$0xff]  ;;  %v4849_v9 = vld [vmem:[#allocation49_spill] sm:$0xff] }
  0xb8   :  { %1076 = vmatpush1.msra.mxu0 %v4813_v10  ;;  %1289 = vmatpush1.msra.mxu1 %v2564_v22  ;;  %v4819_v22 = vld [vmem:[#allocation29_spill] sm:$0xff]  ;;  %v4850_v10 = vand.u32 4294901760, %v4849_v9  ;;  %v4887_v9 = vld [vmem:[#allocation75_spill] sm:$0xff] }
  0xb9   :  { %1080 = vmatprep.subr.mxu0 %v4814_v11  ;;  %1291 = vmatprep.subr.mxu1 %v4712_v50  ;;  %v4820_v60 = vand.u32 4294901760, %v4819_v22  ;;  %v4831_v50 = vld [vmem:[#allocation37_spill] sm:$0xff]  ;;  %v4851_v11 = vld [vmem:[#allocation19_spill] sm:$0xff] }
  0xba   :  { %1084 = vmatpush1.msra.mxu0 %v4815_v15  ;;  %1293 = vmatpush1.msra.mxu1 %v4714_v56  ;;  %v4832_v34 = vand.u32 4294901760, %v4831_v50  ;;  %v4833_v56 = vld [vmem:[#allocation13_spill] sm:$0xff]  ;;  %v4852_v15 = vld [vmem:[#allocation51_spill] sm:$0xff] }
  0xbb   :  { %1088 = vmatprep.subr.mxu0 %v4816_v16  ;;  %1295 = vmatprep.subr.mxu1 %v4716_v44  ;;  %v4835_v44 = vand.u32 4294901760, %v4834_v51  ;;  %v4853_v16 = vand.u32 4294901760, %v4852_v15  ;;  %v4890_v15 = vld [vmem:[#allocation77_spill] sm:$0xff] }
  0xbc   :  { %1092 = vmatpush1.msra.mxu0 %v4817_v17  ;;  %1297 = vmatpush1.msra.mxu1 %v4818_v8  ;;  %v4854_v17 = vld [vmem:[#allocation20_spill] sm:$0xff]  ;;  %v4855_v8 = vld [vmem:[#allocation53_spill] sm:$0xff] }
  0xbd   :  { %1096 = vmatprep.subr.mxu0 %v4820_v60  ;;  %1299 = vmatprep.subr.mxu1 %v4821_v42  ;;  %v4856_v22 = vand.u32 4294901760, %v4855_v8  ;;  %v4857_v60 = vld [vmem:[#allocation21_spill] sm:$0xff]  ;;  %v4858_v42 = vld [vmem:[#allocation55_spill] sm:$0xff] }
  0xbe   :  { %1100 = vmatpush1.msra.mxu0 %v4823_v54  ;;  %1301 = vmatpush1.msra.mxu1 %v4824_v57  ;;  %v4859_v48 = vand.u32 4294901760, %v4858_v42  ;;  %v4860_v54 = vld [vmem:[#allocation22_spill] sm:$0xff]  ;;  %v4861_v57 = vld [vmem:[#allocation57_spill] sm:$0xff]  ;;  %v4893_v8 = vld [vmem:[#allocation79_spill] sm:$0xff] }
  0xbf   :  { %1104 = vmatprep.subr.mxu0 %v4826_v6  ;;  %1303 = vmatprep.subr.mxu1 %v4827_v55  ;;  %v4862_v63 = vand.u32 4294901760, %v4861_v57  ;;  %v4863_v6 = vld [vmem:[#allocation24_spill] sm:$0xff]  ;;  %v4864_v55 = vld [vmem:[#allocation59_spill] sm:$0xff]  ;;  %v4897_v57 = vld [vmem:[#allocation81_spill] sm:$0xff] }
  0xc0   :  { %1108 = vmatpush1.msra.mxu0 %v4829_v53  ;;  %1305 = vmatpush1.msra.mxu1 %v4830_v1  ;;  %v4865_v58 = vand.u32 4294901760, %v4864_v55  ;;  %v4866_v53 = vld [vmem:[#allocation26_spill] sm:$0xff]  ;;  %v4867_v1 = vld [vmem:[#allocation61_spill] sm:$0xff]  ;;  %v74_v42 = vld [vmem:[#allocation2 + $0x178] sm:$0xff] }
  0xc1   :  { %1112 = vmatprep.subr.mxu0 %v4832_v34  ;;  %1307 = vmatprep.subr.mxu1 %v4833_v56  ;;  %v4868_v50 = vand.u32 4294901760, %v4867_v1  ;;  %v4869_v34 = vld [vmem:[#allocation28_spill] sm:$0xff]  ;;  %v4870_v56 = vld [vmem:[#allocation63_spill] sm:$0xff]  ;;  %v71_v55 = vld [vmem:[#allocation2 + $0x160] sm:$0xff]  ;;  %v3707_v1 = vand.u32 4294901760, %v74_v42 }
  0xc2   :  { %1116 = vmatpush1.msra.mxu0 %v4835_v44  ;;  %1309 = vmatpush1.msra.mxu1 %v4836_v61  ;;  %v4871_v51 = vand.u32 4294901760, %v4870_v56  ;;  %v4872_v44 = vld [vmem:[#allocation65_spill] sm:$0xff]  ;;  %v4903_v56 = vld [vmem:[#allocation87_spill] sm:$0xff] }
  0xc3   :  { %1120 = vmatprep.subr.mxu0 %v4838_v23  ;;  %1311 = vmatprep.subr.mxu1 %v4839_v25  ;;  %v4873_v61 = vand.u32 4294901760, %v4872_v44  ;;  %v4875_v23 = vld [vmem:[#allocation67_spill] sm:$0xff]  ;;  %v3717_v44 = vand.u32 4294901760, %v71_v55 }
  0xc4   :  { %1124 = vmatpush1.msra.mxu0 %v4841_v35  ;;  %1313 = vmatpush1.msra.mxu1 %v4842_v40  ;;  %v4876_v25 = vand.u32 4294901760, %v4875_v23  ;;  %v4878_v35 = vld [vmem:[#allocation69_spill] sm:$0xff]  ;;  %v113_v23 = vld [vmem:[#allocation2 + $0x2b0] sm:$0xff] }
  0xc5   :  { %1128 = vmatprep.subr.mxu0 %v4844_v59  ;;  %1315 = vmatprep.subr.mxu1 %v4845_v0  ;;  %v4879_v40 = vand.u32 4294901760, %v4878_v35  ;;  %v4881_v59 = vld [vmem:[#allocation71_spill] sm:$0xff] }
  0xc6   :  { %1132 = vmatpush1.msra.mxu0 %v4847_v4  ;;  %1317 = vmatpush1.msra.mxu1 %v4848_v5  ;;  %v4882_v0 = vand.u32 4294901760, %v4881_v59  ;;  %v4886_v5 = vld [vmem:[#allocation40_spill] sm:$0xff]  ;;  %v65_v35 = vld [vmem:[#allocation2 + $0x130] sm:$0xff] }
  0xc7   :  { %1136 = vmatprep.subr.mxu0 %v4850_v10  ;;  %1319 = vmatprep.subr.mxu1 %v4851_v11  ;;  %v4888_v10 = vand.u32 4294901760, %v4887_v9  ;;  %v4889_v11 = vld [vmem:[#allocation42_spill] sm:$0xff] }
  0xc8   :  { %1140 = vmatpush2.msra.mxu0 %v4853_v16  ;;  %1321 = vmatpush1.msra.mxu1 %v4854_v17  ;;  %v4891_v16 = vand.u32 4294901760, %v4890_v15  ;;  %v4892_v17 = vld [vmem:[#allocation44_spill] sm:$0xff]  ;;  %v4918_v15 = vld [vmem:[#allocation97_spill] sm:$0xff] }
  0xc9   :  { %1144 = vmatprep.subr.mxu0 %v4856_v22  ;;  %1323 = vmatprep.subr.mxu1 %v4857_v60  ;;  %v4894_v22 = vand.u32 4294901760, %v4893_v8  ;;  %v122_v60 = vld [vmem:[#allocation2 + $0x2f8] sm:$0xff] }
  0xca   :  { %1148 = vmatpush2.msra.mxu0 %v4859_v48  ;;  %1325 = vmatpush1.msra.mxu1 %v4860_v54  ;;  %v4895_v48 = vld [vmem:[#allocation80_spill] sm:$0xff] }
  0xcb   :  { %1152 = vmatprep.subr.mxu0 %v4862_v63  ;;  %1327 = vmatprep.subr.mxu1 %v4863_v6  ;;  %v4896_v54 = vand.u32 4294901760, %v4895_v48  ;;  %v4898_v63 = vand.u32 4294901760, %v4897_v57  ;;  %v119_v6 = vld [vmem:[#allocation2 + $0x2e0] sm:$0xff] }
  0xcc   :  { %1156 = vmatpush2.msra.mxu0 %v4865_v58  ;;  %1329 = vmatpush1.msra.mxu1 %v4866_v53  ;;  %v4899_v58 = vld [vmem:[#allocation83_spill] sm:$0xff] }
  0xcd   :  { %1160 = vmatprep.subr.mxu0 %v4868_v50  ;;  %1331 = vmatprep.subr.mxu1 %v4869_v34  ;;  %v4900_v53 = vand.u32 4294901760, %v4899_v58  ;;  %v4901_v50 = vld [vmem:[#allocation85_spill] sm:$0xff] }
  0xce   :  { %1164 = vmatpush2.msra.mxu0 %v4871_v51  ;;  %1333 = vmatpush1.msra.mxu1 %v4754_v26  ;;  %v4884_v26 = vld [vmem:[#allocation73_spill] sm:$0xff]  ;;  %v4902_v34 = vand.u32 4294901760, %v4901_v50  ;;  %v4904_v51 = vand.u32 4294901760, %v4903_v56  ;;  %v4930_v56 = vand.u32 4294901760, %v3406_v41  ;;  %v4932_v41 = vld [vmem:[#allocation104_spill] sm:$0xff] }
  0xcf   :  { %1168 = vmatprep.subr.mxu0 %v4873_v61  ;;  %1335 = vmatprep.subr.mxu1 %v4874_v18  ;;  %v4885_v4 = vand.u32 4294901760, %v4884_v26  ;;  %v4905_v61 = vld [vmem:[#allocation88_spill] sm:$0xff]  ;;  %v4925_v58 = vld [vmem:[#allocation101_spill] sm:$0xff] }
  0xd0   :  { %1172 = vmatpush2.msra.mxu0 %v4876_v25  ;;  %1337 = vmatpush2.msra.mxu1 %v4877_v31  ;;  %v4906_v18 = vand.u32 4294901760, %v4905_v61  ;;  %v4907_v25 = vld [vmem:[#allocation89_spill] sm:$0xff] }
  0xd1   :  { %1176 = vmatprep.subr.mxu0 %v4879_v40  ;;  %1339 = vmatprep.subr.mxu1 %v4880_v45  ;;  %v4908_v31 = vand.u32 4294901760, %v4907_v25  ;;  %v4909_v45 = vld [vmem:[#allocation90_spill] sm:$0xff] }
  0xd2   :  { %1180 = vmatpush2.msra.mxu0 %v4882_v0  ;;  %1341 = vmatpush2.msra.mxu1 %v4883_v3  ;;  %v4910_v59 = vand.u32 4294901760, %v4909_v45  ;;  %v110_v0 = vld [vmem:[#allocation2 + $0x298] sm:$0xff] }
  0xd3   :  { %1184 = vmatprep.subr.mxu0 %v4885_v4  ;;  %1343 = vmatprep.subr.mxu1 %v4886_v5  ;;  %v4912_v3 = vld [vmem:[#allocation92_spill] sm:$0xff]  ;;  %v3744_v4 = vand.u32 4294901760, %v113_v23 }
  0xd4   :  { %1188 = vmatpush2.msra.mxu0 %v4888_v10  ;;  %1345 = vmatpush2.msra.mxu1 %v4889_v11  ;;  %v4913_v26 = vand.u32 4294901760, %v4912_v3  ;;  %v62_v5 = vld [vmem:[#allocation2 + $0x118] sm:$0xff]  ;;  %v4915_v10 = vld [vmem:[#allocation95_spill] sm:$0xff] }
  0xd5   :  { %1192 = vmatprep.subr.mxu0 %v4891_v16  ;;  %1347 = vmatprep.subr.mxu1 %v4892_v17  ;;  %4914 = vst [vmem:[#allocation23_spill] sm:$0xff] %v3744_v4  ;;  %v4916_v11 = vand.u32 4294901760, %v4915_v10  ;;  %v4919_v16 = vand.u32 4294901760, %v4918_v15  ;;  %v4937_v10 = vld [vmem:[#allocation93_spill] sm:$0xff]  ;;  %v101_v15 = vld [vmem:[#allocation2 + $0x250] sm:$0xff] }
  0xd6   :  { %1196 = vmatpush2.msra.mxu0 %v4894_v22  ;;  %1349 = vmatpush2.msra.mxu1 %v4769_v49  ;;  %v3705_v49 = vand.u32 4294901760, %v122_v60  ;;  %v107_v22 = vld [vmem:[#allocation2 + $0x280] sm:$0xff] }
  0xd7   :  { %1200 = vmatprep.subr.mxu0 %v4896_v54  ;;  %1351 = vmatprep.subr.mxu1 %v4771_v28  ;;  %v116_v28 = vld [vmem:[#allocation2 + $0x2c8] sm:$0xff]  ;;  %v4923_v54 = vld [vmem:[#allocation100_spill] sm:$0xff] }
  0xd8   :  { %1204 = vmatpush2.msra.mxu0 %v4898_v63  ;;  %1353 = vmatpush2.msra.mxu1 %v4773_v52  ;;  %v3715_v52 = vand.u32 4294901760, %v119_v6  ;;  %v3731_v40 = vsub.f32 %v122_v60, %v3705_v49  ;;  %v59_v60 = vld [vmem:[#allocation2 + $0x100] sm:$0xff]  ;;  %v4924_v57 = vand.u32 4294901760, %v4923_v54 }
  0xd9   :  { %1208 = vmatprep.subr.mxu0 %v4900_v53  ;;  %1355 = vmatprep.subr.mxu1 %v4775_v47  ;;  %v68_v47 = vld [vmem:[#allocation2 + $0x148] sm:$0xff] }
  0xda   :  { %1212 = vmatpush2.msra.mxu0 %v4902_v34  ;;  %1357 = vmatpush2.msra.mxu1 %v4777_v29  ;;  %v3726_v29 = vsub.f32 %v74_v42, %v3707_v1  ;;  %v3747_v9 = vsub.f32 %v119_v6, %v3715_v52  ;;  %v4532_v17 = vand.u32 4294901760, %v3731_v40  ;;  %v4927_v53 = vld [vmem:[#allocation74_spill] sm:$0xff]  ;;  %v3786_v34 = vand.u32 4294901760, %v107_v22 }
  0xdb   :  { %1216 = vmatprep.subr.mxu0 %v4904_v51  ;;  %1359 = vmatprep.subr.mxu1 %v4779_v21  ;;  %v3728_v21 = vand.u32 4294901760, %v116_v28  ;;  %v4931_v51 = vld [vmem:[#allocation76_spill] sm:$0xff] }
  0xdc   :  { %1220 = vmatpush2.msra.mxu0 %v4906_v18  ;;  %1361 = vmatpush2.msra.mxu1 %v4780_v38  ;;  %v3736_v38 = vand.u32 4294901760, %v68_v47  ;;  %v4530_v8 = vand.u32 4294901760, %v3726_v29  ;;  %v4528_v63 = vand.u32 4294901760, %v3747_v9  ;;  %4928 = vst [vmem:[#allocation27_spill] sm:$0xff] %v3786_v34 }
  0xdd   :  { %1224 = vmatprep.subr.mxu0 %v4908_v31  ;;  %1363 = vmatprep.subr.mxu1 %v4781_v7  ;;  %v3742_v7 = vsub.f32 %v71_v55, %v3717_v44  ;;  %v3762_v42 = vsub.f32 %v116_v28, %v3728_v21  ;;  %v104_v55 = vld [vmem:[#allocation2 + $0x268] sm:$0xff]  ;;  %v3788_v28 = vand.u32 4294901760, %v59_v60  ;;  %v4933_v31 = vand.u32 4294901760, %v4932_v41 }
  0xde   :  { %1228 = vmatpush2.msra.mxu0 %v4910_v59  ;;  %1365 = vmatpush2.msra.mxu1 %v4782_v24  ;;  %4911 = vst [vmem:[#allocation5_spill] sm:$0xff] %v3736_v38  ;;  %v3752_v24 = vand.u32 4294901760, %v65_v35  ;;  %v3768_v48 = vsub.f32 %v68_v47, %v3736_v38  ;;  %v3796_v47 = vsub.f32 %v3731_v40, %v4532_v17  ;;  %v3813_v59 = vand.u32 4294901760, %v104_v55  ;;  %v89_v17 = vld [vmem:[#allocation2 + $0x1f0] sm:$0xff] }
  0xdf   :  { %1232 = vmatprep.subr.mxu0 %v4913_v26  ;;  %1367 = vmatprep.subr.mxu1 %v4783_v12  ;;  %v3757_v12 = vand.u32 4294901760, %v110_v0  ;;  %v4527_v6 = vand.u32 4294901760, %v3742_v7  ;;  %4929 = vst [vmem:[#allocation30_spill] sm:$0xff] %v3788_v28  ;;  %v3801_v61 = vsub.f32 %v3726_v29, %v4530_v8  ;;  %v4526_v18 = vand.u32 4294901760, %v3762_v42  ;;  %v4936_v26 = vld [vmem:[#allocation78_spill] sm:$0xff] }
  0xe0   :  { %1236 = vmatpush2.msra.mxu0 %v4916_v11  ;;  %1369 = vmatpush2.msra.mxu1 %v4784_v39  ;;  %4917 = vst [vmem:[#allocation6_spill] sm:$0xff] %v3752_v24  ;;  %v4921_v39 = vand.u32 4294901760, %v3367_v13  ;;  %v3778_v13 = vsub.f32 %v113_v23, %v3744_v4  ;;  %v3784_v50 = vsub.f32 %v65_v35, %v3752_v24  ;;  %v53_v23 = vld [vmem:[#allocation2 + $0xd0] sm:$0xff]  ;;  %4935 = vst [vmem:[#allocation46_spill] sm:$0xff] %v3813_v59  ;;  %v44_v8 = vld [vmem:[#allocation2 + $0x88] sm:$0xff] }
  0xe1   :  { %1240 = vmatprep.subr.mxu0 %v4919_v16  ;;  %1371 = vmatprep.subr.mxu1 %v4785_v36  ;;  %4920 = vst [vmem:[#allocation25_spill] sm:$0xff] %v3757_v12  ;;  %v3770_v36 = vand.u32 4294901760, %v62_v5  ;;  %v3805_v25 = vsub.f32 %v110_v0, %v3757_v12  ;;  %v4934_v35 = vld [vmem:[#allocation91_spill] sm:$0xff]  ;;  %v4523_v3 = vand.u32 4294901760, %v3768_v48  ;;  %v3821_v0 = vsub.f32 %v3747_v9, %v4528_v63 }
  0xe2   :  { %1244 = vmatpush2.msra.mxu0 %v4921_v39  ;;  %1373 = vmatpush2.msra.mxu1 %v4786_v46  ;;  %v4926_v46 = vand.u32 4294901760, %v4925_v58  ;;  %v3826_v11 = vsub.f32 %v3742_v7, %v4527_v6  ;;  %v4524_v16 = vand.u32 4294901760, %v3778_v13  ;;  %v3834_v39 = vsub.f32 %v59_v60, %v3788_v28 }
  0xe3   :  { %4922 = vst [vmem:[#allocation7_spill] sm:$0xff] %v3770_v36  ;;  %1248 = vmatprep.subr.mxu0 %v4924_v57  ;;  %1375 = vmatprep.subr.mxu1 %v4787_v32  ;;  %v56_v32 = vld [vmem:[#allocation2 + $0xe8] sm:$0xff]  ;;  %v3811_v45 = vsub.f32 %v62_v5, %v3770_v36  ;;  %v3836_v54 = vand.u32 4294901760, %v53_v23  ;;  %v4525_v57 = vand.u32 4294901760, %v3784_v50  ;;  %v3840_v58 = vsub.f32 %v107_v22, %v3786_v34 }
  0xe4   :  { %1252 = vmatpush2.msra.mxu0 %v4926_v46  ;;  %1377 = vmatpush2.msra.mxu1 %v4927_v53  ;;  %v3828_v5 = vand.u32 4294901760, %v56_v32  ;;  %v1636_v46 = vand.u32 4294901760, %v3796_v47  ;;  %v3849_v60 = vsub.f32 %v3762_v42, %v4526_v18  ;;  %v4529_v53 = vand.u32 4294901760, %v3805_v25 }
  0xe5   :  { %1256 = vmatprep.subr.mxu0 %v4930_v56  ;;  %1379 = vmatprep.subr.mxu1 %v4931_v51  ;;  %4939 = vst [vmem:[#allocation50_spill] sm:$0xff] %v3836_v54  ;;  %v3859_v22 = vand.u32 4294901760, %v101_v15  ;;  %v98_v56 = vld [vmem:[#allocation2 + $0x238] sm:$0xff]  ;;  %v4531_v47 = vand.u32 4294901760, %v3811_v45  ;;  %v1531_v41 = vand.u32 4294901760, %v3826_v11  ;;  %v47_v11 = vld [vmem:[#allocation2 + $0xa0] sm:$0xff] }
  0xe6   :  { %1260 = vmatpush2.msra.mxu0 %v4933_v31  ;;  %1262 = vmatprep.mubr.f32.mxu0 %v4934_v35  ;;  %4938 = vst [vmem:[#allocation48_spill] sm:$0xff] %v3828_v5  ;;  %v50_v51 = vld [vmem:[#allocation2 + $0xb8] sm:$0xff]  ;;  %v3870_v31 = vsub.f32 %v56_v32, %v3828_v5  ;;  %v4533_v32 = vand.u32 4294901760, %v3840_v58 }
  0xe7   :  { %1381 = vmatpush2.msra.mxu1 %v4936_v26  ;;  %1264 = vmatmul.mubr.f32.vlgmr.msra.gmra.mxu0 %v4937_v10  ;;  %4940 = vst [vmem:[#allocation52_spill] sm:$0xff] %v3859_v22  ;;  %v3875_v26 = vsub.f32 %v3778_v13, %v4524_v16  ;;  %v3892_v16 = vand.u32 4294901760, %v98_v56  ;;  %v3911_v63 = vsub.f32 %v101_v15, %v3859_v22 }
  0xe8   :  { %1383 = vmatprep.subr.mxu1 %v3217_v43  ;;  %2278 = vmatprep.subr.mxu0 %v3705_v49  ;;  %v1524_v43 = vand.u32 4294901760, %v3801_v61  ;;  %v3863_v61 = vsub.f32 %v104_v55, %v3813_v59  ;;  %v3885_v55 = vsub.f32 %v3784_v50, %v4525_v57  ;;  %v3899_v57 = vand.u32 4294901760, %v50_v51 }
  0xe9   :  { %1385 = vmatpush2.msra.mxu1 %v3228_v37  ;;  %2279 = vmatpush3.msra.mxu0 %v3707_v1  ;;  %v3857_v37 = vsub.f32 %v3768_v48, %v4523_v3  ;;  %v4534_v3 = vand.u32 4294901760, %v3834_v39  ;;  %4942 = vst [vmem:[#allocation56_spill] sm:$0xff] %v3892_v16  ;;  %v3943_v27 = vsub.f32 %v98_v56, %v3892_v16 }
  0xea   :  { %1387 = vmatprep.subr.mxu1 %v4793_v20  ;;  %2280 = vmatprep.subr.mxu0 %v3715_v52  ;;  %v1643_v20 = vand.u32 4294901760, %v3821_v0  ;;  %v95_v0 = vld [vmem:[#allocation2 + $0x220] sm:$0xff]  ;;  %4943 = vst [vmem:[#allocation58_spill] sm:$0xff] %v3899_v57  ;;  %v1545_v15 = vand.u32 4294901760, %v3885_v55  ;;  %v3938_v55 = vsub.f32 %v50_v51, %v3899_v57  ;;  %v4947_v6 = vand.u32 4294901760, %v3863_v61 }
  0xeb   :  { %1389 = vmatpush2.msra.mxu1 %v4795_v62  ;;  %2281 = vmatpush3.msra.mxu0 %v3717_v44  ;;  %v3880_v62 = vsub.f32 %v53_v23, %v3836_v54  ;;  %v3897_v23 = vsub.f32 %v3805_v25, %v4529_v53  ;;  %v1538_v18 = vand.u32 4294901760, %v3857_v37  ;;  %v3916_v53 = vand.u32 4294901760, %v95_v0 }
  0xec   :  { %1391 = vmatprep.subr.mxu1 %v4797_v19  ;;  %2282 = vmatprep.subr.mxu0 %v3728_v21  ;;  %v1650_v19 = vand.u32 4294901760, %v3849_v60  ;;  %v92_v60 = vld [vmem:[#allocation2 + $0x208] sm:$0xff]  ;;  %v3918_v37 = vand.u32 4294901760, %v47_v11 }
  0xed   :  { %4941 = vst [vmem:[#allocation54_spill] sm:$0xff] %v3880_v62  ;;  %1393 = vmatpush2.msra.mxu1 %v3283_v14  ;;  %2283 = vmatpush3.msra.mxu0 %v3736_v38  ;;  %v3907_v14 = vsub.f32 %v3811_v45, %v4531_v47  ;;  %4944 = vst [vmem:[#allocation60_spill] sm:$0xff] %v3916_v53  ;;  %v1664_v47 = vand.u32 4294901760, %v3897_v23  ;;  %v3940_v30 = vand.u32 4294901760, %v92_v60  ;;  %v3952_v23 = vand.u32 4294901760, %v44_v8 }
  0xee   :  { %1395 = vmatprep.subr.mxu1 %v3296_v2  ;;  %2284 = vmatprep.subr.mxu0 %v3744_v4  ;;  %v1657_v2 = vand.u32 4294901760, %v3875_v26  ;;  %4945 = vst [vmem:[#allocation62_spill] sm:$0xff] %v3918_v37  ;;  %v3932_v26 = vsub.f32 %v3834_v39, %v4534_v3  ;;  %v3957_v56 = vsub.f32 %v47_v11, %v3918_v37  ;;  %v4951_v11 = vand.u32 4294901760, %v3880_v62 }
  0xef   :  { %1397 = vmatpush2.msra.mxu1 %v3318_v33  ;;  %1399 = vmatprep.mubr.f32.mxu1 %v4934_v35  ;;  %v3927_v33 = vsub.f32 %v3840_v58, %v4533_v32  ;;  %4946 = vst [vmem:[#allocation64_spill] sm:$0xff] %v3940_v30  ;;  %v41_v32 = vld [vmem:[#allocation2 + $0x70] sm:$0xff]  ;;  %v1552_v3 = vand.u32 4294901760, %v3907_v14  ;;  %4948 = vst [vmem:[#allocation66_spill] sm:$0xff] %v3952_v23  ;;  %v4953_v38 = vand.u32 4294901760, %v3943_v27 }
  0xf0   :  { %2285 = vmatpush3.msra.mxu0 %v3752_v24  ;;  %1401 = vmatmul.mubr.f32.vlgmr.msra.gmra.mxu1 %v4937_v10  ;;  %v38_v24 = vld [vmem:[#allocation2 + $0x58] sm:$0xff]  ;;  %v3977_v4 = vsub.f32 %v3880_v62, %v4951_v11  ;;  %v3991_v62 = vsub.f32 %v44_v8, %v3952_v23 }
  0xf1   :  { %2286 = vmatprep.subr.mxu0 %v3757_v12  ;;  %2313 = vmatprep.subr.mxu1 %v1636_v46  ;;  %v3950_v46 = vsub.f32 %v3863_v61, %v4947_v6  ;;  %v86_v12 = vld [vmem:[#allocation2 + $0x1d8] sm:$0xff]  ;;  %v3967_v6 = vsub.f32 %v95_v0, %v3916_v53  ;;  %v1671_v51 = vand.u32 4294901760, %v3927_v33  ;;  %v83_v33 = vld [vmem:[#allocation2 + $0x1c0] sm:$0xff] }
  0xf2   :  { %2287 = vmatpush3.msra.mxu0 %v3770_v36  ;;  %2314 = vmatpush3.msra.mxu1 %v1524_v43  ;;  %v4949_v43 = vand.u32 4294901760, %v3870_v31  ;;  %v3964_v36 = vand.u32 4294901760, %v89_v17  ;;  %v3980_v0 = vand.u32 4294901760, %v86_v12 }
  0xf3   :  { %2288 = vmatprep.subr.mxu0 %v3786_v34  ;;  %2315 = vmatprep.subr.mxu1 %v1643_v20  ;;  %4950 = vst [vmem:[#allocation68_spill] sm:$0xff] %v3967_v6  ;;  %v1559_v20 = vand.u32 4294901760, %v3932_v26  ;;  %v3972_v34 = vand.u32 4294901760, %v41_v32  ;;  %v3986_v26 = vsub.f32 %v92_v60, %v3940_v30  ;;  %v1678_v11 = vand.u32 4294901760, %v3950_v46 }
  0xf4   :  { %v3962_v14 = vsub.f32 %v3870_v31, %v4949_v43  ;;  %2289 = vmatpush3.msra.mxu0 %v3788_v28  ;;  %2316 = vmatpush3.msra.mxu1 %v1531_v41  ;;  %v35_v43 = vld [vmem:[#allocation2 + $0x40] sm:$0xff]  ;;  %v3983_v41 = vand.u32 4294901760, %v38_v24  ;;  %v4003_v46 = vsub.f32 %v89_v17, %v3964_v36  ;;  %v4010_v28 = vand.u32 4294901760, %v83_v33 }
  0xf5   :  { %2290 = vmatprep.subr.mxu0 %v3813_v59  ;;  %2317 = vmatprep.subr.mxu1 %v1650_v19  ;;  %v4952_v19 = vand.u32 4294901760, %v3911_v63  ;;  %v4007_v8 = vsub.f32 %v41_v32, %v3972_v34  ;;  %v1691_v17 = vsub.f32 %v3943_v27, %v4953_v38  ;;  %v4955_v32 = vand.u32 4294901760, %v3967_v6 }
  0xf6   :  { %2291 = vmatpush3.msra.mxu0 %v3828_v5  ;;  %2318 = vmatpush3.msra.mxu1 %v1538_v18  ;;  %v1566_v60 = vand.u32 4294901760, %v3962_v14  ;;  %v4000_v5 = vand.u32 4294901760, %v35_v43  ;;  %v80_v18 = vld [vmem:[#allocation2 + $0x1a8] sm:$0xff] }
  0xf7   :  { %v1684_v59 = vsub.f32 %v3911_v63, %v4952_v19  ;;  %2292 = vmatprep.subr.mxu0 %v3859_v22  ;;  %2319 = vmatprep.subr.mxu1 %v1657_v2  ;;  %v1573_v19 = vand.u32 4294901760, %v3977_v4  ;;  %v32_v14 = vld [vmem:[#allocation2 + $0x28] sm:$0xff]  ;;  %v4022_v4 = vsub.f32 %v86_v12, %v3980_v0  ;;  %v4028_v22 = vand.u32 4294901760, %v80_v18 }
  0xf8   :  { %2293 = vmatpush3.msra.mxu0 %v3836_v54  ;;  %2320 = vmatpush3.msra.mxu1 %v1545_v15  ;;  %v4018_v54 = vsub.f32 %v38_v24, %v3983_v41  ;;  %v77_v15 = vld [vmem:[#allocation2 + $0x190] sm:$0xff]  ;;  %v1698_v12 = vsub.f32 %v3967_v6, %v4955_v32  ;;  %v4049_v32 = vsub.f32 %v83_v33, %v4010_v28 }
  0xf9   :  { %2294 = vmatprep.subr.mxu0 %v3892_v16  ;;  %2321 = vmatprep.subr.mxu1 %v1664_v47  ;;  %v1685_v2 = vand.u32 4294901760, %v1684_v59  ;;  %v4954_v16 = vand.u32 4294901760, %v3938_v55  ;;  %v29_v24 = vld [vmem:[#allocation2 + $0x10] sm:$0xff]  ;;  %v4038_v59 = vand.u32 4294901760, %v32_v14 }
  0xfa   :  { %2295 = vmatpush3.msra.mxu0 %v3899_v57  ;;  %2322 = vmatpush3.msra.mxu1 %v1552_v3  ;;  %v4036_v57 = vsub.f32 %v35_v43, %v4000_v5  ;;  %4958 = vst [vmem:[#allocation72_spill] sm:$0xff] %v4049_v32  ;;  %v1692_v43 = vand.u32 4294901760, %v1691_v17  ;;  %v4959_v3 = vand.u32 4294901760, %v3986_v26 }
  0xfb   :  { %v1579_v47 = vsub.f32 %v3938_v55, %v4954_v16  ;;  %2296 = vmatprep.subr.mxu0 %v3916_v53  ;;  %2323 = vmatprep.subr.mxu1 %v1671_v51  ;;  %v4957_v16 = vand.u32 4294901760, %v3957_v56  ;;  %v4045_v53 = vand.u32 4294901760, %v77_v15  ;;  %v4960_v51 = vand.u32 4294901760, %v3991_v62 }
  0xfc   :  { %4956 = vst [vmem:[#allocation70_spill] sm:$0xff] %v4036_v57  ;;  %2297 = vmatpush3.msra.mxu0 %v3918_v37  ;;  %2324 = vmatpush3.msra.mxu1 %v1559_v20  ;;  %v1705_v37 = vsub.f32 %v3986_v26, %v4959_v3  ;;  %v4055_v20 = vand.u32 4294901760, %v29_v24  ;;  %v4067_v17 = vsub.f32 %v32_v14, %v4038_v59  ;;  %v4961_v3 = vand.u32 4294901760, %v4003_v46 }
  0xfd   :  { %v1586_v38 = vsub.f32 %v3957_v56, %v4957_v16  ;;  %2298 = vmatprep.subr.mxu0 %v3940_v30  ;;  %2325 = vmatprep.subr.mxu1 %v1678_v11  ;;  %v1580_v16 = vand.u32 4294901760, %v1579_v47  ;;  %v1593_v33 = vsub.f32 %v3991_v62, %v4960_v51  ;;  %v4063_v30 = vsub.f32 %v80_v18, %v4028_v22 }
  0xfe   :  { %2299 = vmatpush3.msra.mxu0 %v3952_v23  ;;  %2326 = vmatpush3.msra.mxu1 %v1566_v60  ;;  %v1699_v11 = vand.u32 4294901760, %v1698_v12  ;;  %v1712_v6 = vsub.f32 %v4003_v46, %v4961_v3  ;;  %v4962_v18 = vand.u32 4294901760, %v4007_v8  ;;  %v4079_v12 = vsub.f32 %v77_v15, %v4045_v53 }
  0xff   :  { %2300 = vmatprep.subr.mxu0 %v3964_v36  ;;  %2327 = vmatprep.subr.mxu1 %v1685_v2  ;;  %v1587_v47 = vand.u32 4294901760, %v1586_v38  ;;  %v1706_v14 = vand.u32 4294901760, %v1705_v37  ;;  %v4083_v3 = vsub.f32 %v29_v24, %v4055_v20  ;;  %v4964_v60 = vand.u32 4294901760, %v4022_v4 }
 0x100   :  { %2301 = vmatpush3.msra.mxu0 %v3972_v34  ;;  %2328 = vmatpush3.msra.mxu1 %v1573_v19  ;;  %v1600_v51 = vsub.f32 %v4007_v8, %v4962_v18  ;;  %v1594_v18 = vand.u32 4294901760, %v1593_v33  ;;  %v4571_v15 = vand.u32 4294901760, %v4063_v30  ;;  %v4965_v37 = vand.u32 4294901760, %v4018_v54 }
 0x101   :  { %2302 = vmatprep.subr.mxu0 %v3980_v0  ;;  %2329 = vmatprep.subr.mxu1 %v1692_v43  ;;  %4963 = vst [vmem:[#allocation82_spill] sm:$0xff] %v4083_v3  ;;  %v1719_v19 = vsub.f32 %v4022_v4, %v4964_v60  ;;  %v1713_v43 = vand.u32 4294901760, %v1712_v6  ;;  %v4966_v38 = vand.u32 4294901760, %v4049_v32  ;;  %v4573_v33 = vand.u32 4294901760, %v4079_v12 }
 0x102   :  { %2303 = vmatpush3.msra.mxu0 %v3983_v41  ;;  %2330 = vmatpush3.msra.mxu1 %v1580_v16  ;;  %v1607_v24 = vsub.f32 %v4018_v54, %v4965_v37  ;;  %v1601_v60 = vand.u32 4294901760, %v1600_v51  ;;  %v4572_v2 = vand.u32 4294901760, %v4083_v3 }
 0x103   :  { %2304 = vmatprep.subr.mxu0 %v4010_v28  ;;  %2331 = vmatprep.subr.mxu1 %v1699_v11  ;;  %v1726_v16 = vsub.f32 %v4049_v32, %v4966_v38  ;;  %v1720_v6 = vand.u32 4294901760, %v1719_v19  ;;  %v4967_v11 = vand.u32 4294901760, %v4036_v57 }
 0x104   :  { %2305 = vmatpush3.msra.mxu0 %v4000_v5  ;;  %2332 = vmatpush3.msra.mxu1 %v1587_v47  ;;  %v1733_v47 = vsub.f32 %v4063_v30, %v4571_v15  ;;  %v1608_v51 = vand.u32 4294901760, %v1607_v24  ;;  %v4970_v24 = vld [vmem:[#allocation103_spill] sm:$0xff] }
 0x105   :  { %2306 = vmatprep.subr.mxu0 %v4028_v22  ;;  %2333 = vmatprep.subr.mxu1 %v1706_v14  ;;  %v1614_v37 = vsub.f32 %v4036_v57, %v4967_v11  ;;  %v4968_v14 = vand.u32 4294901760, %v4067_v17  ;;  %v1727_v38 = vand.u32 4294901760, %v1726_v16  ;;  %v4969_v11 = vld [vmem:[#allocation102_spill] sm:$0xff] }
 0x106   :  { %2307 = vmatpush3.msra.mxu0 %v4038_v59  ;;  %2334 = vmatpush3.msra.mxu1 %v1594_v18  ;;  %v1740_v18 = vsub.f32 %v4079_v12, %v4573_v33  ;;  %v4986_v33 = vld [vmem:[#allocation60_spill] sm:$0xff] }
 0x107   :  { %2308 = vmatprep.subr.mxu0 %v4045_v53  ;;  %2335 = vmatprep.subr.mxu1 %v1713_v43  ;;  %v1621_v19 = vsub.f32 %v4067_v17, %v4968_v14  ;;  %v1615_v15 = vand.u32 4294901760, %v1614_v37  ;;  %v1628_v43 = vsub.f32 %v4083_v3, %v4572_v2  ;;  %v1734_v14 = vand.u32 4294901760, %v1733_v47  ;;  %v4972_v37 = vld [vmem:[#allocation23_spill] sm:$0xff]  ;;  %v4973_v47 = vld [vmem:[#allocation54_spill] sm:$0xff] }
 0x108   :  { %2309 = vmatpush3.msra.mxu0 %v4055_v20  ;;  %2336 = vmatpush3.msra.mxu1 %v1601_v60  ;;  %v1741_v16 = vand.u32 4294901760, %v1740_v18  ;;  %v4977_v18 = vld [vmem:[#allocation68_spill] sm:$0xff]  ;;  %v4985_v2 = vld [vmem:[#allocation58_spill] sm:$0xff] }
 0x109   :  { %1508 = vmatprep.mubr.f32.mxu0 %v4969_v11  ;;  %2337 = vmatprep.subr.mxu1 %v1720_v6  ;;  %v1622_v60 = vand.u32 4294901760, %v1621_v19  ;;  %v1629_v6 = vand.u32 4294901760, %v1628_v43  ;;  %v4975_v19 = vld [vmem:[#allocation25_spill] sm:$0xff]  ;;  %v4978_v11 = vld [vmem:[#allocation27_spill] sm:$0xff]  ;;  %v4979_v43 = vld [vmem:[#allocation30_spill] sm:$0xff] }
 0x10a   :  { %2348 = vmatprep.subr.mxu0 %v3731_v40  ;;  %1514 = vmatmul.mubr.f32.vlgmr.msra.gmra.mxu0 %v4970_v24  ;;  %v4980_v24 = vld [vmem:[#allocation46_spill] sm:$0xff] }
 0x10b   :  { %2338 = vmatpush3.msra.mxu1 %v1608_v51  ;;  %2349 = vmatpush3.msra.mxu0 %v3726_v29  ;;  %v4974_v51 = vld [vmem:[#allocation6_spill] sm:$0xff] }
 0x10c   :  { %2339 = vmatprep.subr.mxu1 %v1727_v38  ;;  %2350 = vmatprep.subr.mxu0 %v3747_v9  ;;  %v4976_v38 = vld [vmem:[#allocation7_spill] sm:$0xff] }
 0x10d   :  { %2340 = vmatpush3.msra.mxu1 %v1615_v15  ;;  %2351 = vmatpush3.msra.mxu0 %v3742_v7  ;;  %v4971_v15 = vld [vmem:[#allocation5_spill] sm:$0xff] }
 0x10e   :  { %2341 = vmatprep.subr.mxu1 %v1734_v14  ;;  %2352 = vmatprep.subr.mxu0 %v3762_v42  ;;  %v4981_v14 = vld [vmem:[#allocation48_spill] sm:$0xff] }
 0x10f   :  { %2342 = vmatpush3.msra.mxu1 %v1622_v60  ;;  %2353 = vmatpush3.msra.mxu0 %v3768_v48  ;;  %v4982_v60 = vld [vmem:[#allocation52_spill] sm:$0xff] }
 0x110   :  { %2343 = vmatprep.subr.mxu1 %v1741_v16  ;;  %2354 = vmatprep.subr.mxu0 %v3778_v13  ;;  %v4983_v16 = vld [vmem:[#allocation50_spill] sm:$0xff] }
 0x111   :  { %2344 = vmatpush3.msra.mxu1 %v1629_v6  ;;  %1744 = vmatprep.mubr.f32.mxu1 %v4934_v35  ;;  %v4984_v6 = vld [vmem:[#allocation56_spill] sm:$0xff] }
 0x112   :  { %2355 = vmatpush3.msra.mxu0 %v3784_v50  ;;  %1746 = vmatmul.mubr.f32.vlgmr.msra.gmra.mxu1 %v4937_v10  ;;  %v4987_v10 = vld [vmem:[#allocation62_spill] sm:$0xff]  ;;  %v4988_v35 = vld [vmem:[#allocation64_spill] sm:$0xff] }
 0x113   :  { %2356 = vmatprep.subr.mxu0 %v3805_v25  ;;  %2383 = vmatprep.subr.mxu1 %v3705_v49 }
 0x114   :  { %2357 = vmatpush3.msra.mxu0 %v3811_v45  ;;  %2384 = vmatpush3.msra.mxu1 %v3707_v1 }
 0x115   :  { %2358 = vmatprep.subr.mxu0 %v3840_v58  ;;  %2385 = vmatprep.subr.mxu1 %v3715_v52 }
 0x116   :  { %2359 = vmatpush3.msra.mxu0 %v3834_v39  ;;  %2386 = vmatpush3.msra.mxu1 %v3717_v44 }
 0x117   :  { %2360 = vmatprep.subr.mxu0 %v3863_v61  ;;  %2387 = vmatprep.subr.mxu1 %v3728_v21 }
 0x118   :  { %2361 = vmatpush3.msra.mxu0 %v3870_v31  ;;  %2388 = vmatpush3.msra.mxu1 %v4971_v15 }
 0x119   :  { %2362 = vmatprep.subr.mxu0 %v3911_v63  ;;  %2389 = vmatprep.subr.mxu1 %v4972_v37 }
 0x11a   :  { %2363 = vmatpush3.msra.mxu0 %v4973_v47  ;;  %2390 = vmatpush3.msra.mxu1 %v4974_v51 }
 0x11b   :  { %2364 = vmatprep.subr.mxu0 %v3943_v27  ;;  %2391 = vmatprep.subr.mxu1 %v4975_v19 }
 0x11c   :  { %2365 = vmatpush3.msra.mxu0 %v3938_v55  ;;  %2392 = vmatpush3.msra.mxu1 %v4976_v38 }
 0x11d   :  { %2366 = vmatprep.subr.mxu0 %v4977_v18  ;;  %2393 = vmatprep.subr.mxu1 %v4978_v11 }
 0x11e   :  { %2367 = vmatpush3.msra.mxu0 %v3957_v56  ;;  %2394 = vmatpush3.msra.mxu1 %v4979_v43 }
 0x11f   :  { %2368 = vmatprep.subr.mxu0 %v3986_v26  ;;  %2395 = vmatprep.subr.mxu1 %v4980_v24 }
 0x120   :  { %2369 = vmatpush3.msra.mxu0 %v3991_v62  ;;  %2396 = vmatpush3.msra.mxu1 %v4981_v14 }
 0x121   :  { %2370 = vmatprep.subr.mxu0 %v4003_v46  ;;  %2397 = vmatprep.subr.mxu1 %v4982_v60 }
 0x122   :  { %2371 = vmatpush3.msra.mxu0 %v4007_v8  ;;  %2398 = vmatpush3.msra.mxu1 %v4983_v16 }
 0x123   :  { %2372 = vmatprep.subr.mxu0 %v4022_v4  ;;  %2399 = vmatprep.subr.mxu1 %v4984_v6 }
 0x124   :  { %2373 = vmatpush3.msra.mxu0 %v4018_v54  ;;  %2400 = vmatpush3.msra.mxu1 %v4985_v2 }
 0x125   :  { %2374 = vmatprep.subr.mxu0 %v4049_v32  ;;  %2401 = vmatprep.subr.mxu1 %v4986_v33  ;;  %v4989_v32 = vld [vmem:[#allocation94_spill] sm:$0xff] }
 0x126   :  { %2375 = vmatpush3.msra.mxu0 %v4036_v57  ;;  %2402 = vmatpush3.msra.mxu1 %v4987_v10  ;;  %v4990_v57 = vld [vmem:[#allocation96_spill] sm:$0xff] }
 0x127   :  { %2376 = vmatprep.subr.mxu0 %v4063_v30  ;;  %2403 = vmatprep.subr.mxu1 %v4988_v35  ;;  %v4991_v35 = vand.u32 4294901760, %v3731_v40  ;;  %v4995_v40 = vand.u32 4294901760, %v3762_v42  ;;  %v5001_v42 = vand.u32 4294901760, %v3805_v25  ;;  %v5005_v25 = vand.u32 4294901760, %v3863_v61 }
 0x128   :  { %2377 = vmatpush3.msra.mxu0 %v4067_v17  ;;  %2404 = vmatpush3.msra.mxu1 %v3952_v23  ;;  %v4992_v23 = vand.u32 4294901760, %v3726_v29  ;;  %v4996_v29 = vand.u32 4294901760, %v3768_v48  ;;  %v5002_v48 = vand.u32 4294901760, %v3811_v45  ;;  %v5012_v45 = vand.u32 4294901760, %v3957_v56  ;;  %v5021_v56 = vld [vmem:[#allocation70_spill] sm:$0xff] }
 0x129   :  { %2378 = vmatprep.subr.mxu0 %v4079_v12  ;;  %2405 = vmatprep.subr.mxu1 %v3964_v36  ;;  %v5016_v61 = vand.u32 4294901760, %v4007_v8  ;;  %v5024_v8 = vld [vmem:[#allocation64_spill] sm:$0xff] }
 0x12a   :  { %2379 = vmatpush3.msra.mxu0 %v4083_v3  ;;  %1881 = vmatprep.mubr.f32.mxu0 %v4989_v32  ;;  %v4993_v3 = vand.u32 4294901760, %v3747_v9  ;;  %v4994_v32 = vand.u32 4294901760, %v3742_v7  ;;  %v4997_v9 = vand.u32 4294901760, %v3778_v13  ;;  %v4999_v7 = vand.u32 4294901760, %v3784_v50 }
 0x12b   :  { %2406 = vmatpush3.msra.mxu1 %v3972_v34  ;;  %1884 = vmatmul.mubr.f32.vlgmr.msra.gmra.mxu0 %v4990_v57  ;;  %v5000_v57 = vld [vmem:[#allocation99_spill] sm:$0xff]  ;;  %v5003_v13 = vand.u32 4294901760, %v3840_v58  ;;  %v5004_v50 = vand.u32 4294901760, %v3834_v39  ;;  %v5014_v39 = vand.u32 4294901760, %v3991_v62  ;;  %v5015_v58 = vand.u32 4294901760, %v4003_v46 }
 0x12c   :  { %2407 = vmatprep.subr.mxu1 %v3980_v0  ;;  %2418 = vmatprep.subr.mxu0 %v4991_v35  ;;  %v4998_v35 = vld [vmem:[#allocation98_spill] sm:$0xff]  ;;  %v5018_v62 = vand.u32 4294901760, %v4018_v54  ;;  %v5023_v46 = vand.u32 4294901760, %v4063_v30  ;;  %v5025_v54 = vand.u32 4294901760, %v4067_v17  ;;  %v5031_v30 = vld [vmem:[#allocation93_spill] sm:$0xff] }
 0x12d   :  { %2408 = vmatpush3.msra.mxu1 %v3983_v41  ;;  %2419 = vmatpush3.msra.mxu0 %v4992_v23 }
 0x12e   :  { %2409 = vmatprep.subr.mxu1 %v4010_v28  ;;  %2420 = vmatprep.subr.mxu0 %v4993_v3  ;;  %v5028_v3 = vld [vmem:[#allocation82_spill] sm:$0xff] }
 0x12f   :  { %2410 = vmatpush3.msra.mxu1 %v4000_v5  ;;  %2421 = vmatpush3.msra.mxu0 %v4994_v32 }
 0x130   :  { %2411 = vmatprep.subr.mxu1 %v4028_v22  ;;  %2422 = vmatprep.subr.mxu0 %v4995_v40 }
 0x131   :  { %2412 = vmatpush3.msra.mxu1 %v4038_v59  ;;  %2423 = vmatpush3.msra.mxu0 %v4996_v29 }
 0x132   :  { %2413 = vmatprep.subr.mxu1 %v4045_v53  ;;  %2424 = vmatprep.subr.mxu0 %v4997_v9 }
 0x133   :  { %2414 = vmatpush3.msra.mxu1 %v4055_v20  ;;  %1988 = vmatprep.mubr.f32.mxu1 %v4998_v35 }
 0x134   :  { %2425 = vmatpush3.msra.mxu0 %v4999_v7  ;;  %1992 = vmatmul.mubr.f32.vlgmr.msra.gmra.mxu1 %v5000_v57 }
 0x135   :  { %2426 = vmatprep.subr.mxu0 %v5001_v42  ;;  %2453 = vmatprep.subr.mxu1 %v3705_v49  ;;  %v5006_v49 = vand.u32 4294901760, %v3870_v31  ;;  %v5017_v31 = vand.u32 4294901760, %v4022_v4  ;;  %v5026_v4 = vld [vmem:[#allocation66_spill] sm:$0xff] }
 0x136   :  { %2427 = vmatpush3.msra.mxu0 %v5002_v48  ;;  %2454 = vmatpush3.msra.mxu1 %v3707_v1  ;;  %v5007_v1 = vand.u32 4294901760, %v3911_v63  ;;  %v5011_v63 = vand.u32 4294901760, %v4977_v18 }
 0x137   :  { %2428 = vmatprep.subr.mxu0 %v5003_v13  ;;  %2455 = vmatprep.subr.mxu1 %v3715_v52  ;;  %v5008_v52 = vand.u32 4294901760, %v4973_v47 }
 0x138   :  { %2429 = vmatpush3.msra.mxu0 %v5004_v50  ;;  %2456 = vmatpush3.msra.mxu1 %v3717_v44  ;;  %v5009_v44 = vand.u32 4294901760, %v3943_v27  ;;  %v5013_v27 = vand.u32 4294901760, %v3986_v26  ;;  %v5022_v26 = vand.u32 4294901760, %v5021_v56 }
 0x139   :  { %2430 = vmatprep.subr.mxu0 %v5005_v25  ;;  %2457 = vmatprep.subr.mxu1 %v3728_v21  ;;  %v5010_v21 = vand.u32 4294901760, %v3938_v55  ;;  %v5019_v55 = vld [vmem:[#allocation72_spill] sm:$0xff] }
 0x13a   :  { %2431 = vmatpush3.msra.mxu0 %v5006_v49  ;;  %2458 = vmatpush3.msra.mxu1 %v4971_v15  ;;  %v5020_v23 = vand.u32 4294901760, %v5019_v55  ;;  %v5030_v15 = vld [vmem:[#allocation91_spill] sm:$0xff] }
 0x13b   :  { %2432 = vmatprep.subr.mxu0 %v5007_v1  ;;  %2459 = vmatprep.subr.mxu1 %v4972_v37 }
 0x13c   :  { %2433 = vmatpush3.msra.mxu0 %v5008_v52  ;;  %2460 = vmatpush3.msra.mxu1 %v4974_v51 }
 0x13d   :  { %2434 = vmatprep.subr.mxu0 %v5009_v44  ;;  %2461 = vmatprep.subr.mxu1 %v4975_v19 }
 0x13e   :  { %2435 = vmatpush3.msra.mxu0 %v5010_v21  ;;  %2462 = vmatpush3.msra.mxu1 %v4976_v38 }
 0x13f   :  { %2436 = vmatprep.subr.mxu0 %v5011_v63  ;;  %2463 = vmatprep.subr.mxu1 %v4978_v11 }
 0x140   :  { %2437 = vmatpush3.msra.mxu0 %v5012_v45  ;;  %2464 = vmatpush3.msra.mxu1 %v4979_v43 }
 0x141   :  { %2438 = vmatprep.subr.mxu0 %v5013_v27  ;;  %2465 = vmatprep.subr.mxu1 %v4980_v24 }
 0x142   :  { %2439 = vmatpush3.msra.mxu0 %v5014_v39  ;;  %2466 = vmatpush3.msra.mxu1 %v4981_v14 }
 0x143   :  { %2440 = vmatprep.subr.mxu0 %v5015_v58  ;;  %2467 = vmatprep.subr.mxu1 %v4982_v60 }
 0x144   :  { %2441 = vmatpush3.msra.mxu0 %v5016_v61  ;;  %2468 = vmatpush3.msra.mxu1 %v4983_v16 }
 0x145   :  { %2442 = vmatprep.subr.mxu0 %v5017_v31  ;;  %2469 = vmatprep.subr.mxu1 %v4984_v6 }
 0x146   :  { %2443 = vmatpush3.msra.mxu0 %v5018_v62  ;;  %2470 = vmatpush3.msra.mxu1 %v4985_v2  ;;  %v5027_v2 = vand.u32 4294901760, %v4079_v12 }
 0x147   :  { %2444 = vmatprep.subr.mxu0 %v5020_v23  ;;  %2471 = vmatprep.subr.mxu1 %v4986_v33  ;;  %v5029_v33 = vand.u32 4294901760, %v5028_v3 }
 0x148   :  { %2445 = vmatpush3.msra.mxu0 %v5022_v26  ;;  %2472 = vmatpush3.msra.mxu1 %v4987_v10  ;;  %v656_v10 = vpop.f32.mrf.mxu1 }
 0x149   :  { %2446 = vmatprep.subr.mxu0 %v5023_v46  ;;  %2473 = vmatprep.subr.mxu1 %v5024_v8 }
 0x14a   :  { %2447 = vmatpush3.msra.mxu0 %v5025_v54  ;;  %2474 = vmatpush3.msra.mxu1 %v5026_v4  ;;  %v658_v17 = vpop.f32.mrf.mxu1 }
 0x14b   :  { %2448 = vmatprep.subr.mxu0 %v5027_v2  ;;  %2475 = vmatprep.subr.mxu1 %v3964_v36  ;;  %v263_v36 = vpop.f32.mrf.mxu0 }
 0x14c   :  { %2449 = vmatpush3.msra.mxu0 %v5029_v33  ;;  %2158 = vmatprep.mubr.f32.mxu0 %v5030_v15 }
 0x14d   :  { %2476 = vmatpush3.msra.mxu1 %v3972_v34  ;;  %2160 = vmatmul.mubr.f32.vlgmr.msra.gmra.mxu0 %v5031_v30  ;;  %v265_v34 = vpop.f32.mrf.mxu0 }
 0x14e   :  { %2477 = vmatprep.subr.mxu1 %v3980_v0  ;;  %2262 = vmatprep.mubr.f32.mxu1 %v5030_v15 }
 0x14f   :  { %2478 = vmatpush3.msra.mxu1 %v3983_v41 }
 0x150   :  { %2479 = vmatprep.subr.mxu1 %v4010_v28  ;;  %v657_v28 = vadd.f32 %v656_v10, %v263_v36 }
 0x151   :  { %2480 = vmatpush3.msra.mxu1 %v4000_v5  ;;  %v659_v5 = vadd.f32 %v658_v17, %v265_v34 }
 0x152   :  { %2481 = vmatprep.subr.mxu1 %v4028_v22 }
 0x153   :  { %2482 = vmatpush3.msra.mxu1 %v4038_v59 }
 0x154   :  { %2483 = vmatprep.subr.mxu1 %v4045_v53 }
 0x155   :  { %2484 = vmatpush3.msra.mxu1 %v4055_v20 }
 0x156   :  { %2264 = vmatmul.mubr.f32.vlgmr.msra.gmra.mxu1 %v5031_v30 }
 0x165   :  { %v859_v0 = vpop.f32.mrf.mxu0 }
 0x166   :  { %v860_v47 = vadd.f32 %v859_v0, %v657_v28 }
 0x167   :  { %v861_v41 = vpop.f32.mrf.mxu0 }
 0x168   :  { %v862_v51 = vadd.f32 %v861_v41, %v659_v5 }
 0x16e   :  { %v1000_v12 = vpop.f32.mrf.mxu1 }
 0x16f   :  { %v1001_v59 = vadd.f32 %v1000_v12, %v860_v47 }
 0x170   :  { %v1002_v22 = vpop.f32.mrf.mxu1 }
 0x171   :  { %v1003_v53 = vadd.f32 %v1002_v22, %v862_v51 }
 0x1a7   :  { %v1265_v37 = vpop.f32.mrf.mxu0 }
 0x1a8   :  { %v1266_v38 = vadd.f32 %v1265_v37, %v1001_v59 }
 0x1a9   :  { %v1267_v19 = vpop.f32.mrf.mxu0 }
 0x1aa   :  { %v1268_v18 = vadd.f32 %v1267_v19, %v1003_v53 }
 0x1b0   :  { %v1402_v20 = vpop.f32.mrf.mxu1 }
 0x1b1   :  { %v1403_v11 = vadd.f32 %v1402_v20, %v1266_v38 }
 0x1b2   :  { %v1404_v43 = vpop.f32.mrf.mxu1 }
 0x1b3   :  { %2269 = vst [vmem:[%s4304_s2] sm:$0xff] %v1403_v11  ;;  %v1405_v24 = vadd.f32 %v1404_v43, %v1268_v18 }
 0x1b5   :  { %2270 = vst [vmem:[%s4304_s2 + $0x8] sm:$0xff] %v1405_v24 }
 0x1ca   :  { %v2310_v14 = vpop.f32.mrf.mxu0 }
 0x1cc   :  { %v2311_v60 = vpop.f32.mrf.mxu0 }
 0x1cd   :  { %v2312_v57 = vadd.f32 %v2311_v60, %v2310_v14 }
 0x1d2   :  { %v2345_v16 = vpop.f32.mrf.mxu1 }
 0x1d4   :  { %v2346_v32 = vpop.f32.mrf.mxu1 }
 0x1d5   :  { %v2347_v35 = vadd.f32 %v2346_v32, %v2345_v16 }
 0x1d7   :  { %v1748_v13 = vadd.f32 %v2347_v35, %v2312_v57 }
 0x1eb   :  { %v2380_v6 = vpop.f32.mrf.mxu0 }
 0x1ed   :  { %v2381_v40 = vpop.f32.mrf.mxu0 }
 0x1ee   :  { %v2382_v42 = vadd.f32 %v2381_v40, %v2380_v6 }
 0x1f0   :  { %v1886_v25 = vadd.f32 %v2382_v42, %v1748_v13 }
 0x1f4   :  { %v2415_v29 = vpop.f32.mrf.mxu1 }
 0x1f6   :  { %v2416_v7 = vpop.f32.mrf.mxu1 }
 0x1f7   :  { %v2417_v50 = vadd.f32 %v2416_v7, %v2415_v29 }
 0x1f9   :  { %v1994_v52 = vadd.f32 %v2417_v50, %v1886_v25 }
 0x20d   :  { %v2450_v9 = vpop.f32.mrf.mxu0 }
 0x20f   :  { %v2451_v48 = vpop.f32.mrf.mxu0 }
 0x210   :  { %v2452_v49 = vadd.f32 %v2451_v48, %v2450_v9 }
 0x212   :  { %v2162_v21 = vadd.f32 %v2452_v49, %v1994_v52 }
 0x216   :  { %v2485_v1 = vpop.f32.mrf.mxu1 }
 0x218   :  { %v2486_v44 = vpop.f32.mrf.mxu1 }
 0x219   :  { %v2487_v63 = vadd.f32 %v2486_v44, %v2485_v1 }
 0x21b   :  { %v2266_v45 = vadd.f32 %v2487_v63, %v2162_v21 }
 0x21d   :  { %2272 = vst.msk [vmem:[%s4304_s2 + $0x10] sm:$0xff] %vm2271_vm0, %v2266_v45 }
 0x21e   :  { %2277 = vsyncpa [#allocation3], 1 }

</bundles_post_ra>
